<compile_context>
chip_gen: v5e
topology: v5e:2x2
jax: 0.10.0
libtpu: 0.0.40
codegen_flags: <defaults>
</compile_context>

<pallas_src>
import functools

import jax
import jax.numpy as jnp
from jax.experimental import pallas as pl
from jax.experimental.pallas import tpu as pltpu


# --------------------------------------------------------------------------
# Tile-size helpers
# --------------------------------------------------------------------------
def _min_sublane_mult(itemsize):
    # f32 tiles are (8, 128); 2-byte dtypes pack 16 rows per sublane tile.
    return 8 if itemsize >= 4 else 16


def _pick_row_tile(Ho, Wo, Cout, itemsize, target_bytes=2 * 1024 * 1024):
    """Output rows per conv grid step: th | Ho, (th*Wo) sublane-aligned (or full),
    output tile <= target bytes so double-buffered VMEM stays small (v7x)."""
    mult = _min_sublane_mult(itemsize)
    cands = [th for th in range(1, Ho + 1)
             if Ho % th == 0 and ((th * Wo) % mult == 0 or th == Ho)]
    fitting = [th for th in cands if th * Wo * Cout * itemsize <= target_bytes]
    return max(fitting) if fitting else min(cands)


def _pick_flat_tile(HW, C, itemsize, target_bytes=2 * 1024 * 1024):
    mult = _min_sublane_mult(itemsize)
    cands = [t for t in range(1, HW + 1)
             if HW % t == 0 and (t % mult == 0 or t == HW)]
    fitting = [t for t in cands if t * C * itemsize <= target_bytes]
    return max(fitting) if fitting else min(cands)


# --------------------------------------------------------------------------
# Pallas kernel 1: fused 3x3 conv (9 shifted MXU matmuls) + InstanceNorm stats
# --------------------------------------------------------------------------
def _make_conv_stats_kernel(stride, th, Wo, Cin, Cout):
    def kernel(x_ref, w_ref, y_ref, sum_ref, ssq_ref):
        # x_ref : (th_in, Wp, Cin) padded input row band for this tile
        # w_ref : (9, Cin, Cout)   weights, row index = kh*3 + kw
        # y_ref : (th*Wo, Cout)    conv output tile
        # sum_ref/ssq_ref : (1, Cout) per-channel stats, accumulated over tiles
        t = pl.program_id(1)
        acc = jnp.zeros((th * Wo, Cout), jnp.float32)
        for kh in range(3):
            rows = pl.ds(kh, th) if stride == 1 else pl.ds(kh, th, stride)
            for kw in range(3):
                cols = pl.ds(kw, Wo) if stride == 1 else pl.ds(kw, Wo, stride)
                xs = x_ref[rows, cols, :].reshape(th * Wo, Cin)
                acc = acc + jnp.dot(xs, w_ref[kh * 3 + kw],
                                    preferred_element_type=jnp.float32)
        y_ref[...] = acc.astype(y_ref.dtype)

        # Fused InstanceNorm statistics (single pass, f32 accumulation).
        s = jnp.sum(acc, axis=0, keepdims=True)          # (1, Cout)
        q = jnp.sum(acc * acc, axis=0, keepdims=True)    # (1, Cout)

        @pl.when(t == 0)
        def _():
            sum_ref[...] = s
            ssq_ref[...] = q

        @pl.when(t > 0)
        def _():
            sum_ref[...] = sum_ref[...] + s
            ssq_ref[...] = ssq_ref[...] + q

    return kernel


def _conv3x3_stats(x_nhwc, w9, stride, pad_mode, compute_dtype):
    """x: (N,H,W,Cin); w9: (9,Cin,Cout).
    Returns y: (N, Ho*Wo, Cout) in compute_dtype, per-channel sum / sum-of-squares
    (N,1,Cout) f32, plus (Ho, Wo).  Conv bias intentionally omitted (cancelled by
    the following InstanceNorm(affine=False))."""
    N, H, W, Cin = x_nhwc.shape
    Cout = w9.shape[-1]
    Ho = (H + 2 - 3) // stride + 1
    Wo = (W + 2 - 3) // stride + 1
    Wp = W + 2
    itemsize = jnp.dtype(compute_dtype).itemsize

    xp = jnp.pad(x_nhwc, ((0, 0), (1, 1), (1, 1), (0, 0)),
                 mode=pad_mode).astype(compute_dtype)

    th = _pick_row_tile(Ho, Wo, Cout, itemsize)
    n_tiles = Ho // th
    th_in = (th - 1) * stride + 3            # padded input rows needed per band
    # Row bands with a 1-row halo (tiny duplication; avoids any im2col blowup).
    bands = jnp.stack(
        [xp[:, t * th * stride: t * th * stride + th_in] for t in range(n_tiles)],
        axis=1)                               # (N, n_tiles, th_in, Wp, Cin)

    kernel = _make_conv_stats_kernel(stride, th, Wo, Cin, Cout)
    flops = 2 * N * Ho * Wo * 9 * Cin * Cout
    bytes_accessed = int(bands.size * itemsize + w9.size * itemsize
                         + N * Ho * Wo * Cout * itemsize + 2 * N * Cout * 4)

    y, s, q = pl.pallas_call(
        kernel,
        grid=(N, n_tiles),
        in_specs=[
            pl.BlockSpec((None, None, th_in, Wp, Cin),
                         lambda n, t: (n, t, 0, 0, 0)),
            pl.BlockSpec((9, Cin, Cout), lambda n, t: (0, 0, 0)),
        ],
        out_specs=(
            pl.BlockSpec((None, th * Wo, Cout), lambda n, t: (n, t, 0)),
            pl.BlockSpec((None, 1, Cout), lambda n, t: (n, 0, 0)),
            pl.BlockSpec((None, 1, Cout), lambda n, t: (n, 0, 0)),
        ),
        out_shape=(
            jax.ShapeDtypeStruct((N, Ho * Wo, Cout), compute_dtype),
            jax.ShapeDtypeStruct((N, 1, Cout), jnp.float32),
            jax.ShapeDtypeStruct((N, 1, Cout), jnp.float32),
        ),
        compiler_params=pltpu.CompilerParams(
            dimension_semantics=("parallel", "arbitrary")),
        cost_estimate=pl.CostEstimate(flops=flops, transcendentals=0,
                                      bytes_accessed=bytes_accessed),
    )(bands, w9)
    return y, s, q, Ho, Wo


# --------------------------------------------------------------------------
# Pallas kernel 2: apply InstanceNorm (+ ReLU, + residual) from fused stats
# --------------------------------------------------------------------------
def _make_norm_kernel(relu, has_residual, inv_hw, eps=1e-5):
    def kernel(*refs):
        if has_residual:
            x_ref, s_ref, q_ref, r_ref, o_ref = refs
        else:
            x_ref, s_ref, q_ref, o_ref = refs
        x = x_ref[...].astype(jnp.float32)              # (thw, C)
        mean = s_ref[...] * inv_hw                      # (1, C)
        var = q_ref[...] * inv_hw - mean * mean
        inv_std = jax.lax.rsqrt(jnp.maximum(var, 0.0) + eps)
        y = (x - mean) * inv_std
        if relu:
            y = jnp.maximum(y, 0.0)
        if has_residual:
            y = y + r_ref[...].astype(jnp.float32)
        o_ref[...] = y.astype(o_ref.dtype)

    return kernel


def _instance_norm_apply(y, s, q, relu, residual=None):
    """y: (N, HW, C); s, q: (N, 1, C) f32 sums over HW."""
    N, HW, C = y.shape
    itemsize = jnp.dtype(y.dtype).itemsize
    thw = _pick_flat_tile(HW, C, itemsize)
    n_tiles = HW // thw

    kernel = _make_norm_kernel(relu, residual is not None, 1.0 / HW)
    x_spec = pl.BlockSpec((None, thw, C), lambda n, t: (n, t, 0))
    stat_spec = pl.BlockSpec((None, 1, C), lambda n, t: (n, 0, 0))
    in_specs = [x_spec, stat_spec, stat_spec]
    args = [y, s, q]
    if residual is not None:
        in_specs.append(x_spec)
        args.append(residual)

    return pl.pallas_call(
        kernel,
        grid=(N, n_tiles),
        in_specs=in_specs,
        out_specs=x_spec,
        out_shape=jax.ShapeDtypeStruct((N, HW, C), y.dtype),
        compiler_params=pltpu.CompilerParams(
            dimension_semantics=("parallel", "parallel")),
    )(*args)


# --------------------------------------------------------------------------
# Blocks
# --------------------------------------------------------------------------
def _prep_w(w_torch, dtype):
    # torch layout (Cout, Cin, 3, 3) -> (9, Cin, Cout), row index = kh*3 + kw
    Cout, Cin = w_torch.shape[0], w_torch.shape[1]
    return jnp.transpose(w_torch, (2, 3, 1, 0)).reshape(9, Cin, Cout).astype(dtype)


def resnet_block(h_flat, H, W, w1p, w2p, compute_dtype):
    N, HW, C = h_flat.shape
    x4 = h_flat.reshape(N, H, W, C)
    y1, s1, q1, Ho, Wo = _conv3x3_stats(x4, w1p, 1, "reflect", compute_dtype)
    a1 = _instance_norm_apply(y1, s1, q1, relu=True)
    # use_dropout=False -> no dropout layer
    y2, s2, q2, _, _ = _conv3x3_stats(a1.reshape(N, Ho, Wo, C), w2p, 1,
                                      "reflect", compute_dtype)
    return _instance_norm_apply(y2, s2, q2, relu=False, residual=h_flat)


def pyramid_block(x_nchw, params, compute_dtype=jnp.float32):
    x = jnp.transpose(x_nchw, (0, 2, 3, 1)).astype(compute_dtype)   # NCHW -> NHWC
    N, H, W, _ = x.shape

    # Stem: Conv3x3 stride 2 (zero pad) -> InstanceNorm -> LeakyReLU(True)
    # (negative_slope=1.0 == identity, so no activation applied).
    # Conv biases are dropped everywhere: InstanceNorm(affine=False) subtracts
    # the per-channel mean, which cancels any per-channel constant exactly.
    w0 = _prep_w(params["w0"], compute_dtype)
    y0, s0, q0, Ho, Wo = _conv3x3_stats(x, w0, stride=2, pad_mode="constant",
                                        compute_dtype=compute_dtype)
    h = _instance_norm_apply(y0, s0, q0, relu=False)
    C = w0.shape[-1]

    for i in range(4):
        w1, _b1, w2, _b2 = params[f"res{i}"]
        h = resnet_block(h, Ho, Wo,
                         _prep_w(w1, compute_dtype), _prep_w(w2, compute_dtype),
                         compute_dtype)

    out = h.reshape(N, Ho, Wo, C)
    return jnp.transpose(out, (0, 3, 1, 2)).astype(x_nchw.dtype)    # NHWC -> NCHW


# --------------------------------------------------------------------------
# Deterministic parameter init (normal * 0.02, zero bias), torch conv layout
# --------------------------------------------------------------------------
def init_params(key, dim):
    d2 = dim * 2
    keys = jax.random.split(key, 9)
    params = {
        "w0": jax.random.normal(keys[0], (d2, dim, 3, 3), jnp.float32) * 0.02,
        "b0": jnp.zeros((d2,), jnp.float32),
    }
    for i in range(4):
        params[f"res{i}"] = (
            jax.random.normal(keys[1 + 2 * i], (d2, d2, 3, 3), jnp.float32) * 0.02,
            jnp.zeros((d2,), jnp.float32),
            jax.random.normal(keys[2 + 2 * i], (d2, d2, 3, 3), jnp.float32) * 0.02,
            jnp.zeros((d2,), jnp.float32),
        )
    return params


# --------------------------------------------------------------------------
# Pure-JAX reference (for correctness check)
# --------------------------------------------------------------------------
def _ref_conv(x, w, b, stride, pad_mode):
    xp = jnp.pad(x, ((0, 0), (1, 1), (1, 1), (0, 0)), mode=pad_mode)
    y = jax.lax.conv_general_dilated(
        xp, w, window_strides=(stride, stride), padding="VALID",
        dimension_numbers=("NHWC", "OIHW", "NHWC"))
    return y + b


def _ref_inorm(x, eps=1e-5):
    m = jnp.mean(x, axis=(1, 2), keepdims=True)
    v = jnp.mean((x - m) ** 2, axis=(1, 2), keepdims=True)
    return (x - m) * jax.lax.rsqrt(v + eps)


def pyramid_block_ref(x_nchw, params):
    x = jnp.transpose(x_nchw, (0, 2, 3, 1))
    h = _ref_inorm(_ref_conv(x, params["w0"], params["b0"], 2, "constant"))
    h = jnp.where(h >= 0.0, h, 1.0 * h)                  # LeakyReLU(slope=1) == id
    for i in range(4):
        w1, b1, w2, b2 = params[f"res{i}"]
        r = jnp.maximum(_ref_inorm(_ref_conv(h, w1, b1, 1, "reflect")), 0.0)
        r = _ref_inorm(_ref_conv(r, w2, b2, 1, "reflect"))
        h = h + r
    return jnp.transpose(h, (0, 3, 1, 2))


# --------------------------------------------------------------------------
if __name__ == "__main__":
    key = jax.random.PRNGKey(0)
    kx, kp = jax.random.split(key)
    N, dim, H, W = 2, 4, 16, 16
    x = jax.random.normal(kx, (N, dim, H, W), jnp.float32)
    params = init_params(kp, dim)

    fwd = jax.jit(pyramid_block, static_argnames=("compute_dtype",))

    # f32 path: must match the pure-JAX reference.
    out = jax.block_until_ready(fwd(x, params))
    ref = jax.block_until_ready(pyramid_block_ref(x, params))
    assert out.shape == (N, 2 * dim, H // 2, W // 2), out.shape
    err = float(jnp.max(jnp.abs(out - ref)))
    assert err < 2e-3, f"mismatch vs reference: {err}"

    # bf16 MXU path (halves HBM traffic / boosts MXU throughput at real sizes);
    # accumulation and statistics stay in f32 inside the kernels.
    out_bf16 = jax.block_until_ready(fwd(x, params, compute_dtype=jnp.bfloat16))
    assert out_bf16.shape == out.shape
    assert bool(jnp.all(jnp.isfinite(out_bf16.astype(jnp.float32))))

    print("KERNEL_OK")
</pallas_src>

<mosaic_0001>
module attributes {stable_mosaic.version = 11 : i64} {
  func.func @kernel(%arg0: i32, %arg1: i32, %arg2: memref<1x64x8xf32, #tpu.memory_space<vmem>>, %arg3: memref<1x1x8xf32, #tpu.memory_space<vmem>>, %arg4: memref<1x1x8xf32, #tpu.memory_space<vmem>>, %arg5: memref<1x64x8xf32, #tpu.memory_space<vmem>>) attributes {dimension_semantics = [#tpu.dimension_semantics<parallel>, #tpu.dimension_semantics<parallel>], iteration_bounds = array<i64: 2, 1>, scalar_prefetch = 0 : i64, scratch_operands = 0 : i64, tpu.core_type = #tpu.core_type<tc>, window_params = [{transform_indices = @transform_0, window_bounds = array<i64: 1, 64, 8>}, {transform_indices = @transform_1, window_bounds = array<i64: 1, 1, 8>}, {transform_indices = @transform_2, window_bounds = array<i64: 1, 1, 8>}, {transform_indices = @transform_3, window_bounds = array<i64: 1, 64, 8>}]} {
    %c0 = arith.constant 0 : index
    %c0_0 = arith.constant 0 : index
    %c0_1 = arith.constant 0 : index
    %0 = vector.load %arg2[%c0, %c0_0, %c0_1] : memref<1x64x8xf32, #tpu.memory_space<vmem>>, vector<1x64x8xf32>
    %1 = vector.shape_cast %0 : vector<1x64x8xf32> to vector<64x8xf32>
    %c0_2 = arith.constant 0 : index
    %c0_3 = arith.constant 0 : index
    %c0_4 = arith.constant 0 : index
    %2 = vector.load %arg3[%c0_2, %c0_3, %c0_4] : memref<1x1x8xf32, #tpu.memory_space<vmem>>, vector<1x1x8xf32>
    %3 = vector.shape_cast %2 : vector<1x1x8xf32> to vector<1x8xf32>
    %cst = arith.constant 1.562500e-02 : f32
    %4 = vector.broadcast %cst : f32 to vector<1x8xf32>
    %5 = arith.mulf %3, %4 : vector<1x8xf32>
    %c0_5 = arith.constant 0 : index
    %c0_6 = arith.constant 0 : index
    %c0_7 = arith.constant 0 : index
    %6 = vector.load %arg4[%c0_5, %c0_6, %c0_7] : memref<1x1x8xf32, #tpu.memory_space<vmem>>, vector<1x1x8xf32>
    %7 = vector.shape_cast %6 : vector<1x1x8xf32> to vector<1x8xf32>
    %cst_8 = arith.constant 1.562500e-02 : f32
    %8 = vector.broadcast %cst_8 : f32 to vector<1x8xf32>
    %9 = arith.mulf %7, %8 : vector<1x8xf32>
    %10 = arith.mulf %5, %5 : vector<1x8xf32>
    %11 = arith.subf %9, %10 : vector<1x8xf32>
    %cst_9 = arith.constant 0.000000e+00 : f32
    %12 = vector.broadcast %cst_9 : f32 to vector<1x8xf32>
    %13 = arith.maximumf %11, %12 : vector<1x8xf32>
    %cst_10 = arith.constant 9.99999974E-6 : f32
    %14 = vector.broadcast %cst_10 : f32 to vector<1x8xf32>
    %15 = arith.addf %13, %14 : vector<1x8xf32>
    %16 = math.rsqrt %15 : vector<1x8xf32>
    %17 = vector.broadcast %5 : vector<1x8xf32> to vector<64x8xf32>
    %18 = arith.subf %1, %17 : vector<64x8xf32>
    %19 = vector.broadcast %16 : vector<1x8xf32> to vector<64x8xf32>
    %20 = arith.mulf %18, %19 : vector<64x8xf32>
    %c0_11 = arith.constant 0 : index
    %c0_12 = arith.constant 0 : index
    %c0_13 = arith.constant 0 : index
    %21 = vector.load %arg5[%c0_11, %c0_12, %c0_13] : memref<1x64x8xf32, #tpu.memory_space<vmem>>, vector<1x64x8xf32>
    %22 = vector.shape_cast %21 : vector<1x64x8xf32> to vector<64x8xf32>
    %23 = vector.shape_cast %20 : vector<64x8xf32> to vector<1x64x8xf32>
    tpu.vector_store %arg5[%c0_11, %c0_12, %c0_13], %23 {strides = array<i32>} : memref<1x64x8xf32, #tpu.memory_space<vmem>>, vector<1x64x8xf32>,
    return
  }
  func.func @transform_0(%arg0: i32, %arg1: i32) -> (i32, i32, i32) {
    %c0_i32 = arith.constant 0 : i32
    %c0_i32_0 = arith.constant 0 : i32
    return %arg0, %arg1, %c0_i32 : i32, i32, i32
  }
  func.func @transform_1(%arg0: i32, %arg1: i32) -> (i32, i32, i32) {
    %c0_i32 = arith.constant 0 : i32
    %c0_i32_0 = arith.constant 0 : i32
    %c0_i32_1 = arith.constant 0 : i32
    return %arg0, %c0_i32, %c0_i32_0 : i32, i32, i32
  }
  func.func @transform_2(%arg0: i32, %arg1: i32) -> (i32, i32, i32) {
    %c0_i32 = arith.constant 0 : i32
    %c0_i32_0 = arith.constant 0 : i32
    %c0_i32_1 = arith.constant 0 : i32
    return %arg0, %c0_i32, %c0_i32_0 : i32, i32, i32
  }
  func.func @transform_3(%arg0: i32, %arg1: i32) -> (i32, i32, i32) {
    %c0_i32 = arith.constant 0 : i32
    %c0_i32_0 = arith.constant 0 : i32
    return %arg0, %arg1, %c0_i32 : i32, i32, i32
  }
}

module attributes {stable_mosaic.version = 11 : i64} {
  func.func @kernel(%arg0: i32, %arg1: i32, %arg2: memref<1x1x17x18x4xf32, #tpu.memory_space<vmem>>, %arg3: memref<9x4x8xf32, #tpu.memory_space<vmem>>, %arg4: memref<1x64x8xf32, #tpu.memory_space<vmem>>, %arg5: memref<1x1x8xf32, #tpu.memory_space<vmem>>, %arg6: memref<1x1x8xf32, #tpu.memory_space<vmem>>) attributes {dimension_semantics = [#tpu.dimension_semantics<parallel>, #tpu.dimension_semantics<arbitrary>], iteration_bounds = array<i64: 2, 1>, scalar_prefetch = 0 : i64, scratch_operands = 0 : i64, tpu.core_type = #tpu.core_type<tc>, window_params = [{transform_indices = @transform_0, window_bounds = array<i64: 1, 1, 17, 18, 4>}, {pipeline_mode = #tpu.pipeline_mode<synchronous>, transform_indices = @transform_1, window_bounds = array<i64: 9, 4, 8>}, {transform_indices = @transform_2, window_bounds = array<i64: 1, 64, 8>}, {transform_indices = @transform_3, window_bounds = array<i64: 1, 1, 8>}, {transform_indices = @transform_4, window_bounds = array<i64: 1, 1, 8>}]} {
    %cst = arith.constant 0.000000e+00 : f32
    %0 = vector.broadcast %cst : f32 to vector<64x8xf32>
    %c0 = arith.constant 0 : index
    %c0_0 = arith.constant 0 : index
    %c0_1 = arith.constant 0 : index
    %c0_2 = arith.constant 0 : index
    %c0_3 = arith.constant 0 : index
    %1 = tpu.strided_load %arg2[%c0, %c0_0, %c0_1, %c0_2, %c0_3] {strides = array<i32: 1, 1, 2, 2, 1>} : memref<1x1x17x18x4xf32, #tpu.memory_space<vmem>>, vector<1x1x8x8x4xf32>
    %2 = vector.shape_cast %1 : vector<1x1x8x8x4xf32> to vector<8x8x4xf32>
    %3 = vector.shape_cast %2 : vector<8x8x4xf32> to vector<64x4xf32>
    %c0_4 = arith.constant 0 : index
    %c0_5 = arith.constant 0 : index
    %c0_6 = arith.constant 0 : index
    %4 = vector.load %arg3[%c0_4, %c0_5, %c0_6] : memref<9x4x8xf32, #tpu.memory_space<vmem>>, vector<1x4x8xf32>
    %5 = vector.shape_cast %4 : vector<1x4x8xf32> to vector<4x8xf32>
    %cst_7 = arith.constant dense<0.000000e+00> : vector<64x8xf32>
    %6 = tpu.matmul %3, %5, %cst_7 {dimension_numbers = #tpu.dot_dimension_numbers<[1], [0], [0], [1], [0, 0, 1, 1], [], []>} : vector<64x4xf32>, vector<4x8xf32>, vector<64x8xf32> -> vector<64x8xf32>
    %7 = arith.addf %0, %6 : vector<64x8xf32>
    %c0_8 = arith.constant 0 : index
    %c0_9 = arith.constant 0 : index
    %c0_10 = arith.constant 0 : index
    %c1 = arith.constant 1 : index
    %c0_11 = arith.constant 0 : index
    %8 = tpu.strided_load %arg2[%c0_8, %c0_9, %c0_10, %c1, %c0_11] {strides = array<i32: 1, 1, 2, 2, 1>} : memref<1x1x17x18x4xf32, #tpu.memory_space<vmem>>, vector<1x1x8x8x4xf32>
    %9 = vector.shape_cast %8 : vector<1x1x8x8x4xf32> to vector<8x8x4xf32>
    %10 = vector.shape_cast %9 : vector<8x8x4xf32> to vector<64x4xf32>
    %c1_12 = arith.constant 1 : index
    %c0_13 = arith.constant 0 : index
    %c0_14 = arith.constant 0 : index
    %11 = vector.load %arg3[%c1_12, %c0_13, %c0_14] : memref<9x4x8xf32, #tpu.memory_space<vmem>>, vector<1x4x8xf32>
    %12 = vector.shape_cast %11 : vector<1x4x8xf32> to vector<4x8xf32>
    %cst_15 = arith.constant dense<0.000000e+00> : vector<64x8xf32>
    %13 = tpu.matmul %10, %12, %cst_15 {dimension_numbers = #tpu.dot_dimension_numbers<[1], [0], [0], [1], [0, 0, 1, 1], [], []>} : vector<64x4xf32>, vector<4x8xf32>, vector<64x8xf32> -> vector<64x8xf32>
    %14 = arith.addf %7, %13 : vector<64x8xf32>
    %c0_16 = arith.constant 0 : index
    %c0_17 = arith.constant 0 : index
    %c0_18 = arith.constant 0 : index
    %c2 = arith.constant 2 : index
    %c0_19 = arith.constant 0 : index
    %15 = tpu.strided_load %arg2[%c0_16, %c0_17, %c0_18, %c2, %c0_19] {strides = array<i32: 1, 1, 2, 2, 1>} : memref<1x1x17x18x4xf32, #tpu.memory_space<vmem>>, vector<1x1x8x8x4xf32>
    %16 = vector.shape_cast %15 : vector<1x1x8x8x4xf32> to vector<8x8x4xf32>
    %17 = vector.shape_cast %16 : vector<8x8x4xf32> to vector<64x4xf32>
    %c2_20 = arith.constant 2 : index
    %c0_21 = arith.constant 0 : index
    %c0_22 = arith.constant 0 : index
    %18 = vector.load %arg3[%c2_20, %c0_21, %c0_22] : memref<9x4x8xf32, #tpu.memory_space<vmem>>, vector<1x4x8xf32>
    %19 = vector.shape_cast %18 : vector<1x4x8xf32> to vector<4x8xf32>
    %cst_23 = arith.constant dense<0.000000e+00> : vector<64x8xf32>
    %20 = tpu.matmul %17, %19, %cst_23 {dimension_numbers = #tpu.dot_dimension_numbers<[1], [0], [0], [1], [0, 0, 1, 1], [], []>} : vector<64x4xf32>, vector<4x8xf32>, vector<64x8xf32> -> vector<64x8xf32>
    %21 = arith.addf %14, %20 : vector<64x8xf32>
    %c0_24 = arith.constant 0 : index
    %c0_25 = arith.constant 0 : index
    %c1_26 = arith.constant 1 : index
    %c0_27 = arith.constant 0 : index
    %c0_28 = arith.constant 0 : index
    %22 = tpu.strided_load %arg2[%c0_24, %c0_25, %c1_26, %c0_27, %c0_28] {strides = array<i32: 1, 1, 2, 2, 1>} : memref<1x1x17x18x4xf32, #tpu.memory_space<vmem>>, vector<1x1x8x8x4xf32>
    %23 = vector.shape_cast %22 : vector<1x1x8x8x4xf32> to vector<8x8x4xf32>
    %24 = vector.shape_cast %23 : vector<8x8x4xf32> to vector<64x4xf32>
    %c3 = arith.constant 3 : index
    %c0_29 = arith.constant 0 : index
    %c0_30 = arith.constant 0 : index
    %25 = vector.load %arg3[%c3, %c0_29, %c0_30] : memref<9x4x8xf32, #tpu.memory_space<vmem>>, vector<1x4x8xf32>
    %26 = vector.shape_cast %25 : vector<1x4x8xf32> to vector<4x8xf32>
    %cst_31 = arith.constant dense<0.000000e+00> : vector<64x8xf32>
    %27 = tpu.matmul %24, %26, %cst_31 {dimension_numbers = #tpu.dot_dimension_numbers<[1], [0], [0], [1], [0, 0, 1, 1], [], []>} : vector<64x4xf32>, vector<4x8xf32>, vector<64x8xf32> -> vector<64x8xf32>
    %28 = arith.addf %21, %27 : vector<64x8xf32>
    %c0_32 = arith.constant 0 : index
    %c0_33 = arith.constant 0 : index
    %c1_34 = arith.constant 1 : index
    %c1_35 = arith.constant 1 : index
    %c0_36 = arith.constant 0 : index
    %29 = tpu.strided_load %arg2[%c0_32, %c0_33, %c1_34, %c1_35, %c0_36] {strides = array<i32: 1, 1, 2, 2, 1>} : memref<1x1x17x18x4xf32, #tpu.memory_space<vmem>>, vector<1x1x8x8x4xf32>
    %30 = vector.shape_cast %29 : vector<1x1x8x8x4xf32> to vector<8x8x4xf32>
    %31 = vector.shape_cast %30 : vector<8x8x4xf32> to vector<64x4xf32>
    %c4 = arith.constant 4 : index
    %c0_37 = arith.constant 0 : index
    %c0_38 = arith.constant 0 : index
    %32 = vector.load %arg3[%c4, %c0_37, %c0_38] : memref<9x4x8xf32, #tpu.memory_space<vmem>>, vector<1x4x8xf32>
    %33 = vector.shape_cast %32 : vector<1x4x8xf32> to vector<4x8xf32>
    %cst_39 = arith.constant dense<0.000000e+00> : vector<64x8xf32>
    %34 = tpu.matmul %31, %33, %cst_39 {dimension_numbers = #tpu.dot_dimension_numbers<[1], [0], [0], [1], [0, 0, 1, 1], [], []>} : vector<64x4xf32>, vector<4x8xf32>, vector<64x8xf32> -> vector<64x8xf32>
    %35 = arith.addf %28, %34 : vector<64x8xf32>
    %c0_40 = arith.constant 0 : index
    %c0_41 = arith.constant 0 : index
    %c1_42 = arith.constant 1 : index
    %c2_43 = arith.constant 2 : index
    %c0_44 = arith.constant 0 : index
    %36 = tpu.strided_load %arg2[%c0_40, %c0_41, %c1_42, %c2_43, %c0_44] {strides = array<i32: 1, 1, 2, 2, 1>} : memref<1x1x17x18x4xf32, #tpu.memory_space<vmem>>, vector<1x1x8x8x4xf32>
    %37 = vector.shape_cast %36 : vector<1x1x8x8x4xf32> to vector<8x8x4xf32>
    %38 = vector.shape_cast %37 : vector<8x8x4xf32> to vector<64x4xf32>
    %c5 = arith.constant 5 : index
    %c0_45 = arith.constant 0 : index
    %c0_46 = arith.constant 0 : index
    %39 = vector.load %arg3[%c5, %c0_45, %c0_46] : memref<9x4x8xf32, #tpu.memory_space<vmem>>, vector<1x4x8xf32>
    %40 = vector.shape_cast %39 : vector<1x4x8xf32> to vector<4x8xf32>
    %cst_47 = arith.constant dense<0.000000e+00> : vector<64x8xf32>
    %41 = tpu.matmul %38, %40, %cst_47 {dimension_numbers = #tpu.dot_dimension_numbers<[1], [0], [0], [1], [0, 0, 1, 1], [], []>} : vector<64x4xf32>, vector<4x8xf32>, vector<64x8xf32> -> vector<64x8xf32>
    %42 = arith.addf %35, %41 : vector<64x8xf32>
    %c0_48 = arith.constant 0 : index
    %c0_49 = arith.constant 0 : index
    %c2_50 = arith.constant 2 : index
    %c0_51 = arith.constant 0 : index
    %c0_52 = arith.constant 0 : index
    %43 = tpu.strided_load %arg2[%c0_48, %c0_49, %c2_50, %c0_51, %c0_52] {strides = array<i32: 1, 1, 2, 2, 1>} : memref<1x1x17x18x4xf32, #tpu.memory_space<vmem>>, vector<1x1x8x8x4xf32>
    %44 = vector.shape_cast %43 : vector<1x1x8x8x4xf32> to vector<8x8x4xf32>
    %45 = vector.shape_cast %44 : vector<8x8x4xf32> to vector<64x4xf32>
    %c6 = arith.constant 6 : index
    %c0_53 = arith.constant 0 : index
    %c0_54 = arith.constant 0 : index
    %46 = vector.load %arg3[%c6, %c0_53, %c0_54] : memref<9x4x8xf32, #tpu.memory_space<vmem>>, vector<1x4x8xf32>
    %47 = vector.shape_cast %46 : vector<1x4x8xf32> to vector<4x8xf32>
    %cst_55 = arith.constant dense<0.000000e+00> : vector<64x8xf32>
    %48 = tpu.matmul %45, %47, %cst_55 {dimension_numbers = #tpu.dot_dimension_numbers<[1], [0], [0], [1], [0, 0, 1, 1], [], []>} : vector<64x4xf32>, vector<4x8xf32>, vector<64x8xf32> -> vector<64x8xf32>
    %49 = arith.addf %42, %48 : vector<64x8xf32>
    %c0_56 = arith.constant 0 : index
    %c0_57 = arith.constant 0 : index
    %c2_58 = arith.constant 2 : index
    %c1_59 = arith.constant 1 : index
    %c0_60 = arith.constant 0 : index
    %50 = tpu.strided_load %arg2[%c0_56, %c0_57, %c2_58, %c1_59, %c0_60] {strides = array<i32: 1, 1, 2, 2, 1>} : memref<1x1x17x18x4xf32, #tpu.memory_space<vmem>>, vector<1x1x8x8x4xf32>
    %51 = vector.shape_cast %50 : vector<1x1x8x8x4xf32> to vector<8x8x4xf32>
    %52 = vector.shape_cast %51 : vector<8x8x4xf32> to vector<64x4xf32>
    %c7 = arith.constant 7 : index
    %c0_61 = arith.constant 0 : index
    %c0_62 = arith.constant 0 : index
    %53 = vector.load %arg3[%c7, %c0_61, %c0_62] : memref<9x4x8xf32, #tpu.memory_space<vmem>>, vector<1x4x8xf32>
    %54 = vector.shape_cast %53 : vector<1x4x8xf32> to vector<4x8xf32>
    %cst_63 = arith.constant dense<0.000000e+00> : vector<64x8xf32>
    %55 = tpu.matmul %52, %54, %cst_63 {dimension_numbers = #tpu.dot_dimension_numbers<[1], [0], [0], [1], [0, 0, 1, 1], [], []>} : vector<64x4xf32>, vector<4x8xf32>, vector<64x8xf32> -> vector<64x8xf32>
    %56 = arith.addf %49, %55 : vector<64x8xf32>
    %c0_64 = arith.constant 0 : index
    %c0_65 = arith.constant 0 : index
    %c2_66 = arith.constant 2 : index
    %c2_67 = arith.constant 2 : index
    %c0_68 = arith.constant 0 : index
    %57 = tpu.strided_load %arg2[%c0_64, %c0_65, %c2_66, %c2_67, %c0_68] {strides = array<i32: 1, 1, 2, 2, 1>} : memref<1x1x17x18x4xf32, #tpu.memory_space<vmem>>, vector<1x1x8x8x4xf32>
    %58 = vector.shape_cast %57 : vector<1x1x8x8x4xf32> to vector<8x8x4xf32>
    %59 = vector.shape_cast %58 : vector<8x8x4xf32> to vector<64x4xf32>
    %c8 = arith.constant 8 : index
    %c0_69 = arith.constant 0 : index
    %c0_70 = arith.constant 0 : index
    %60 = vector.load %arg3[%c8, %c0_69, %c0_70] : memref<9x4x8xf32, #tpu.memory_space<vmem>>, vector<1x4x8xf32>
    %61 = vector.shape_cast %60 : vector<1x4x8xf32> to vector<4x8xf32>
    %cst_71 = arith.constant dense<0.000000e+00> : vector<64x8xf32>
    %62 = tpu.matmul %59, %61, %cst_71 {dimension_numbers = #tpu.dot_dimension_numbers<[1], [0], [0], [1], [0, 0, 1, 1], [], []>} : vector<64x4xf32>, vector<4x8xf32>, vector<64x8xf32> -> vector<64x8xf32>
    %63 = arith.addf %56, %62 : vector<64x8xf32>
    %c0_72 = arith.constant 0 : index
    %c0_73 = arith.constant 0 : index
    %c0_74 = arith.constant 0 : index
    %64 = vector.load %arg4[%c0_72, %c0_73, %c0_74] : memref<1x64x8xf32, #tpu.memory_space<vmem>>, vector<1x64x8xf32>
    %65 = vector.shape_cast %64 : vector<1x64x8xf32> to vector<64x8xf32>
    %66 = vector.shape_cast %63 : vector<64x8xf32> to vector<1x64x8xf32>
    tpu.vector_store %arg4[%c0_72, %c0_73, %c0_74], %66 {strides = array<i32>} : memref<1x64x8xf32, #tpu.memory_space<vmem>>, vector<1x64x8xf32>,
    %cst_75 = arith.constant dense<0.000000e+00> : vector<8xf32>
    %67 = vector.multi_reduction <add>, %63, %cst_75 [0] : vector<64x8xf32> to vector<8xf32>
    %68 = vector.shape_cast %67 : vector<8xf32> to vector<1x8xf32>
    %69 = arith.mulf %63, %63 : vector<64x8xf32>
    %cst_76 = arith.constant dense<0.000000e+00> : vector<8xf32>
    %70 = vector.multi_reduction <add>, %69, %cst_76 [0] : vector<64x8xf32> to vector<8xf32>
    %71 = vector.shape_cast %70 : vector<8xf32> to vector<1x8xf32>
    %c0_i32 = arith.constant 0 : i32
    %72 = arith.cmpi eq, %arg1, %c0_i32 : i32
    %73 = arith.extui %72 : i1 to i32
    %c0_i32_77 = arith.constant 0 : i32
    %74 = arith.cmpi ne, %73, %c0_i32_77 : i32
    scf.if %74 {
      %c0_80 = arith.constant 0 : index
      %c0_81 = arith.constant 0 : index
      %c0_82 = arith.constant 0 : index
      %78 = vector.load %arg5[%c0_80, %c0_81, %c0_82] : memref<1x1x8xf32, #tpu.memory_space<vmem>>, vector<1x1x8xf32>
      %79 = vector.shape_cast %78 : vector<1x1x8xf32> to vector<1x8xf32>
      %80 = vector.shape_cast %68 : vector<1x8xf32> to vector<1x1x8xf32>
      tpu.vector_store %arg5[%c0_80, %c0_81, %c0_82], %80 {strides = array<i32>} : memref<1x1x8xf32, #tpu.memory_space<vmem>>, vector<1x1x8xf32>,
      %c0_83 = arith.constant 0 : index
      %c0_84 = arith.constant 0 : index
      %c0_85 = arith.constant 0 : index
      %81 = vector.load %arg6[%c0_83, %c0_84, %c0_85] : memref<1x1x8xf32, #tpu.memory_space<vmem>>, vector<1x1x8xf32>
      %82 = vector.shape_cast %81 : vector<1x1x8xf32> to vector<1x8xf32>
      %83 = vector.shape_cast %71 : vector<1x8xf32> to vector<1x1x8xf32>
      tpu.vector_store %arg6[%c0_83, %c0_84, %c0_85], %83 {strides = array<i32>} : memref<1x1x8xf32, #tpu.memory_space<vmem>>, vector<1x1x8xf32>,
    } else {
    }
    %c0_i32_78 = arith.constant 0 : i32
    %75 = arith.cmpi sgt, %arg1, %c0_i32_78 : i32
    %76 = arith.extui %75 : i1 to i32
    %c0_i32_79 = arith.constant 0 : i32
    %77 = arith.cmpi ne, %76, %c0_i32_79 : i32
    scf.if %77 {
      %c0_80 = arith.constant 0 : index
      %c0_81 = arith.constant 0 : index
      %c0_82 = arith.constant 0 : index
      %78 = vector.load %arg5[%c0_80, %c0_81, %c0_82] : memref<1x1x8xf32, #tpu.memory_space<vmem>>, vector<1x1x8xf32>
      %79 = vector.shape_cast %78 : vector<1x1x8xf32> to vector<1x8xf32>
      %80 = arith.addf %79, %68 : vector<1x8xf32>
      %c0_83 = arith.constant 0 : index
      %c0_84 = arith.constant 0 : index
      %c0_85 = arith.constant 0 : index
      %81 = vector.load %arg5[%c0_83, %c0_84, %c0_85] : memref<1x1x8xf32, #tpu.memory_space<vmem>>, vector<1x1x8xf32>
      %82 = vector.shape_cast %81 : vector<1x1x8xf32> to vector<1x8xf32>
      %83 = vector.shape_cast %80 : vector<1x8xf32> to vector<1x1x8xf32>
      tpu.vector_store %arg5[%c0_83, %c0_84, %c0_85], %83 {strides = array<i32>} : memref<1x1x8xf32, #tpu.memory_space<vmem>>, vector<1x1x8xf32>,
      %c0_86 = arith.constant 0 : index
      %c0_87 = arith.constant 0 : index
      %c0_88 = arith.constant 0 : index
      %84 = vector.load %arg6[%c0_86, %c0_87, %c0_88] : memref<1x1x8xf32, #tpu.memory_space<vmem>>, vector<1x1x8xf32>
      %85 = vector.shape_cast %84 : vector<1x1x8xf32> to vector<1x8xf32>
      %86 = arith.addf %85, %71 : vector<1x8xf32>
      %c0_89 = arith.constant 0 : index
      %c0_90 = arith.constant 0 : index
      %c0_91 = arith.constant 0 : index
      %87 = vector.load %arg6[%c0_89, %c0_90, %c0_91] : memref<1x1x8xf32, #tpu.memory_space<vmem>>, vector<1x1x8xf32>
      %88 = vector.shape_cast %87 : vector<1x1x8xf32> to vector<1x8xf32>
      %89 = vector.shape_cast %86 : vector<1x8xf32> to vector<1x1x8xf32>
      tpu.vector_store %arg6[%c0_89, %c0_90, %c0_91], %89 {strides = array<i32>} : memref<1x1x8xf32, #tpu.memory_space<vmem>>, vector<1x1x8xf32>,
    } else {
    }
    return
  }
  func.func @transform_0(%arg0: i32, %arg1: i32) -> (i32, i32, i32, i32, i32) {
    %c0_i32 = arith.constant 0 : i32
    %c0_i32_0 = arith.constant 0 : i32
    %c0_i32_1 = arith.constant 0 : i32
    %c0_i32_2 = arith.constant 0 : i32
    return %arg0, %arg1, %c0_i32, %c0_i32_0, %c0_i32_1 : i32, i32, i32, i32, i32
  }
  func.func @transform_1(%arg0: i32, %arg1: i32) -> (i32, i32, i32) {
    %c0_i32 = arith.constant 0 : i32
    %c0_i32_0 = arith.constant 0 : i32
    %c0_i32_1 = arith.constant 0 : i32
    %c0_i32_2 = arith.constant 0 : i32
    return %c0_i32, %c0_i32_0, %c0_i32_1 : i32, i32, i32
  }
  func.func @transform_2(%arg0: i32, %arg1: i32) -> (i32, i32, i32) {
    %c0_i32 = arith.constant 0 : i32
    %c0_i32_0 = arith.constant 0 : i32
    return %arg0, %arg1, %c0_i32 : i32, i32, i32
  }
  func.func @transform_3(%arg0: i32, %arg1: i32) -> (i32, i32, i32) {
    %c0_i32 = arith.constant 0 : i32
    %c0_i32_0 = arith.constant 0 : i32
    %c0_i32_1 = arith.constant 0 : i32
    return %arg0, %c0_i32, %c0_i32_0 : i32, i32, i32
  }
  func.func @transform_4(%arg0: i32, %arg1: i32) -> (i32, i32, i32) {
    %c0_i32 = arith.constant 0 : i32
    %c0_i32_0 = arith.constant 0 : i32
    %c0_i32_1 = arith.constant 0 : i32
    return %arg0, %c0_i32, %c0_i32_0 : i32, i32, i32
  }
}

module attributes {stable_mosaic.version = 11 : i64} {
  func.func @kernel(%arg0: i32, %arg1: i32, %arg2: memref<1x1x10x10x8xf32, #tpu.memory_space<vmem>>, %arg3: memref<9x8x8xf32, #tpu.memory_space<vmem>>, %arg4: memref<1x64x8xf32, #tpu.memory_space<vmem>>, %arg5: memref<1x1x8xf32, #tpu.memory_space<vmem>>, %arg6: memref<1x1x8xf32, #tpu.memory_space<vmem>>) attributes {dimension_semantics = [#tpu.dimension_semantics<parallel>, #tpu.dimension_semantics<arbitrary>], iteration_bounds = array<i64: 2, 1>, scalar_prefetch = 0 : i64, scratch_operands = 0 : i64, tpu.core_type = #tpu.core_type<tc>, window_params = [{transform_indices = @transform_0, window_bounds = array<i64: 1, 1, 10, 10, 8>}, {pipeline_mode = #tpu.pipeline_mode<synchronous>, transform_indices = @transform_1, window_bounds = array<i64: 9, 8, 8>}, {transform_indices = @transform_2, window_bounds = array<i64: 1, 64, 8>}, {transform_indices = @transform_3, window_bounds = array<i64: 1, 1, 8>}, {transform_indices = @transform_4, window_bounds = array<i64: 1, 1, 8>}]} {
    %cst = arith.constant 0.000000e+00 : f32
    %0 = vector.broadcast %cst : f32 to vector<64x8xf32>
    %c0 = arith.constant 0 : index
    %c0_0 = arith.constant 0 : index
    %c0_1 = arith.constant 0 : index
    %c0_2 = arith.constant 0 : index
    %c0_3 = arith.constant 0 : index
    %1 = vector.load %arg2[%c0, %c0_0, %c0_1, %c0_2, %c0_3] : memref<1x1x10x10x8xf32, #tpu.memory_space<vmem>>, vector<1x1x8x8x8xf32>
    %2 = vector.shape_cast %1 : vector<1x1x8x8x8xf32> to vector<8x8x8xf32>
    %3 = vector.shape_cast %2 : vector<8x8x8xf32> to vector<64x8xf32>
    %c0_4 = arith.constant 0 : index
    %c0_5 = arith.constant 0 : index
    %c0_6 = arith.constant 0 : index
    %4 = vector.load %arg3[%c0_4, %c0_5, %c0_6] : memref<9x8x8xf32, #tpu.memory_space<vmem>>, vector<1x8x8xf32>
    %5 = vector.shape_cast %4 : vector<1x8x8xf32> to vector<8x8xf32>
    %cst_7 = arith.constant dense<0.000000e+00> : vector<64x8xf32>
    %6 = tpu.matmul %3, %5, %cst_7 {dimension_numbers = #tpu.dot_dimension_numbers<[1], [0], [0], [1], [0, 0, 1, 1], [], []>} : vector<64x8xf32>, vector<8x8xf32>, vector<64x8xf32> -> vector<64x8xf32>
    %7 = arith.addf %0, %6 : vector<64x8xf32>
    %c0_8 = arith.constant 0 : index
    %c0_9 = arith.constant 0 : index
    %c0_10 = arith.constant 0 : index
    %c1 = arith.constant 1 : index
    %c0_11 = arith.constant 0 : index
    %8 = vector.load %arg2[%c0_8, %c0_9, %c0_10, %c1, %c0_11] : memref<1x1x10x10x8xf32, #tpu.memory_space<vmem>>, vector<1x1x8x8x8xf32>
    %9 = vector.shape_cast %8 : vector<1x1x8x8x8xf32> to vector<8x8x8xf32>
    %10 = vector.shape_cast %9 : vector<8x8x8xf32> to vector<64x8xf32>
    %c1_12 = arith.constant 1 : index
    %c0_13 = arith.constant 0 : index
    %c0_14 = arith.constant 0 : index
    %11 = vector.load %arg3[%c1_12, %c0_13, %c0_14] : memref<9x8x8xf32, #tpu.memory_space<vmem>>, vector<1x8x8xf32>
    %12 = vector.shape_cast %11 : vector<1x8x8xf32> to vector<8x8xf32>
    %cst_15 = arith.constant dense<0.000000e+00> : vector<64x8xf32>
    %13 = tpu.matmul %10, %12, %cst_15 {dimension_numbers = #tpu.dot_dimension_numbers<[1], [0], [0], [1], [0, 0, 1, 1], [], []>} : vector<64x8xf32>, vector<8x8xf32>, vector<64x8xf32> -> vector<64x8xf32>
    %14 = arith.addf %7, %13 : vector<64x8xf32>
    %c0_16 = arith.constant 0 : index
    %c0_17 = arith.constant 0 : index
    %c0_18 = arith.constant 0 : index
    %c2 = arith.constant 2 : index
    %c0_19 = arith.constant 0 : index
    %15 = vector.load %arg2[%c0_16, %c0_17, %c0_18, %c2, %c0_19] : memref<1x1x10x10x8xf32, #tpu.memory_space<vmem>>, vector<1x1x8x8x8xf32>
    %16 = vector.shape_cast %15 : vector<1x1x8x8x8xf32> to vector<8x8x8xf32>
    %17 = vector.shape_cast %16 : vector<8x8x8xf32> to vector<64x8xf32>
    %c2_20 = arith.constant 2 : index
    %c0_21 = arith.constant 0 : index
    %c0_22 = arith.constant 0 : index
    %18 = vector.load %arg3[%c2_20, %c0_21, %c0_22] : memref<9x8x8xf32, #tpu.memory_space<vmem>>, vector<1x8x8xf32>
    %19 = vector.shape_cast %18 : vector<1x8x8xf32> to vector<8x8xf32>
    %cst_23 = arith.constant dense<0.000000e+00> : vector<64x8xf32>
    %20 = tpu.matmul %17, %19, %cst_23 {dimension_numbers = #tpu.dot_dimension_numbers<[1], [0], [0], [1], [0, 0, 1, 1], [], []>} : vector<64x8xf32>, vector<8x8xf32>, vector<64x8xf32> -> vector<64x8xf32>
    %21 = arith.addf %14, %20 : vector<64x8xf32>
    %c0_24 = arith.constant 0 : index
    %c0_25 = arith.constant 0 : index
    %c1_26 = arith.constant 1 : index
    %c0_27 = arith.constant 0 : index
    %c0_28 = arith.constant 0 : index
    %22 = vector.load %arg2[%c0_24, %c0_25, %c1_26, %c0_27, %c0_28] : memref<1x1x10x10x8xf32, #tpu.memory_space<vmem>>, vector<1x1x8x8x8xf32>
    %23 = vector.shape_cast %22 : vector<1x1x8x8x8xf32> to vector<8x8x8xf32>
    %24 = vector.shape_cast %23 : vector<8x8x8xf32> to vector<64x8xf32>
    %c3 = arith.constant 3 : index
    %c0_29 = arith.constant 0 : index
    %c0_30 = arith.constant 0 : index
    %25 = vector.load %arg3[%c3, %c0_29, %c0_30] : memref<9x8x8xf32, #tpu.memory_space<vmem>>, vector<1x8x8xf32>
    %26 = vector.shape_cast %25 : vector<1x8x8xf32> to vector<8x8xf32>
    %cst_31 = arith.constant dense<0.000000e+00> : vector<64x8xf32>
    %27 = tpu.matmul %24, %26, %cst_31 {dimension_numbers = #tpu.dot_dimension_numbers<[1], [0], [0], [1], [0, 0, 1, 1], [], []>} : vector<64x8xf32>, vector<8x8xf32>, vector<64x8xf32> -> vector<64x8xf32>
    %28 = arith.addf %21, %27 : vector<64x8xf32>
    %c0_32 = arith.constant 0 : index
    %c0_33 = arith.constant 0 : index
    %c1_34 = arith.constant 1 : index
    %c1_35 = arith.constant 1 : index
    %c0_36 = arith.constant 0 : index
    %29 = vector.load %arg2[%c0_32, %c0_33, %c1_34, %c1_35, %c0_36] : memref<1x1x10x10x8xf32, #tpu.memory_space<vmem>>, vector<1x1x8x8x8xf32>
    %30 = vector.shape_cast %29 : vector<1x1x8x8x8xf32> to vector<8x8x8xf32>
    %31 = vector.shape_cast %30 : vector<8x8x8xf32> to vector<64x8xf32>
    %c4 = arith.constant 4 : index
    %c0_37 = arith.constant 0 : index
    %c0_38 = arith.constant 0 : index
    %32 = vector.load %arg3[%c4, %c0_37, %c0_38] : memref<9x8x8xf32, #tpu.memory_space<vmem>>, vector<1x8x8xf32>
    %33 = vector.shape_cast %32 : vector<1x8x8xf32> to vector<8x8xf32>
    %cst_39 = arith.constant dense<0.000000e+00> : vector<64x8xf32>
    %34 = tpu.matmul %31, %33, %cst_39 {dimension_numbers = #tpu.dot_dimension_numbers<[1], [0], [0], [1], [0, 0, 1, 1], [], []>} : vector<64x8xf32>, vector<8x8xf32>, vector<64x8xf32> -> vector<64x8xf32>
    %35 = arith.addf %28, %34 : vector<64x8xf32>
    %c0_40 = arith.constant 0 : index
    %c0_41 = arith.constant 0 : index
    %c1_42 = arith.constant 1 : index
    %c2_43 = arith.constant 2 : index
    %c0_44 = arith.constant 0 : index
    %36 = vector.load %arg2[%c0_40, %c0_41, %c1_42, %c2_43, %c0_44] : memref<1x1x10x10x8xf32, #tpu.memory_space<vmem>>, vector<1x1x8x8x8xf32>
    %37 = vector.shape_cast %36 : vector<1x1x8x8x8xf32> to vector<8x8x8xf32>
    %38 = vector.shape_cast %37 : vector<8x8x8xf32> to vector<64x8xf32>
    %c5 = arith.constant 5 : index
    %c0_45 = arith.constant 0 : index
    %c0_46 = arith.constant 0 : index
    %39 = vector.load %arg3[%c5, %c0_45, %c0_46] : memref<9x8x8xf32, #tpu.memory_space<vmem>>, vector<1x8x8xf32>
    %40 = vector.shape_cast %39 : vector<1x8x8xf32> to vector<8x8xf32>
    %cst_47 = arith.constant dense<0.000000e+00> : vector<64x8xf32>
    %41 = tpu.matmul %38, %40, %cst_47 {dimension_numbers = #tpu.dot_dimension_numbers<[1], [0], [0], [1], [0, 0, 1, 1], [], []>} : vector<64x8xf32>, vector<8x8xf32>, vector<64x8xf32> -> vector<64x8xf32>
    %42 = arith.addf %35, %41 : vector<64x8xf32>
    %c0_48 = arith.constant 0 : index
    %c0_49 = arith.constant 0 : index
    %c2_50 = arith.constant 2 : index
    %c0_51 = arith.constant 0 : index
    %c0_52 = arith.constant 0 : index
    %43 = vector.load %arg2[%c0_48, %c0_49, %c2_50, %c0_51, %c0_52] : memref<1x1x10x10x8xf32, #tpu.memory_space<vmem>>, vector<1x1x8x8x8xf32>
    %44 = vector.shape_cast %43 : vector<1x1x8x8x8xf32> to vector<8x8x8xf32>
    %45 = vector.shape_cast %44 : vector<8x8x8xf32> to vector<64x8xf32>
    %c6 = arith.constant 6 : index
    %c0_53 = arith.constant 0 : index
    %c0_54 = arith.constant 0 : index
    %46 = vector.load %arg3[%c6, %c0_53, %c0_54] : memref<9x8x8xf32, #tpu.memory_space<vmem>>, vector<1x8x8xf32>
    %47 = vector.shape_cast %46 : vector<1x8x8xf32> to vector<8x8xf32>
    %cst_55 = arith.constant dense<0.000000e+00> : vector<64x8xf32>
    %48 = tpu.matmul %45, %47, %cst_55 {dimension_numbers = #tpu.dot_dimension_numbers<[1], [0], [0], [1], [0, 0, 1, 1], [], []>} : vector<64x8xf32>, vector<8x8xf32>, vector<64x8xf32> -> vector<64x8xf32>
    %49 = arith.addf %42, %48 : vector<64x8xf32>
    %c0_56 = arith.constant 0 : index
    %c0_57 = arith.constant 0 : index
    %c2_58 = arith.constant 2 : index
    %c1_59 = arith.constant 1 : index
    %c0_60 = arith.constant 0 : index
    %50 = vector.load %arg2[%c0_56, %c0_57, %c2_58, %c1_59, %c0_60] : memref<1x1x10x10x8xf32, #tpu.memory_space<vmem>>, vector<1x1x8x8x8xf32>
    %51 = vector.shape_cast %50 : vector<1x1x8x8x8xf32> to vector<8x8x8xf32>
    %52 = vector.shape_cast %51 : vector<8x8x8xf32> to vector<64x8xf32>
    %c7 = arith.constant 7 : index
    %c0_61 = arith.constant 0 : index
    %c0_62 = arith.constant 0 : index
    %53 = vector.load %arg3[%c7, %c0_61, %c0_62] : memref<9x8x8xf32, #tpu.memory_space<vmem>>, vector<1x8x8xf32>
    %54 = vector.shape_cast %53 : vector<1x8x8xf32> to vector<8x8xf32>
    %cst_63 = arith.constant dense<0.000000e+00> : vector<64x8xf32>
    %55 = tpu.matmul %52, %54, %cst_63 {dimension_numbers = #tpu.dot_dimension_numbers<[1], [0], [0], [1], [0, 0, 1, 1], [], []>} : vector<64x8xf32>, vector<8x8xf32>, vector<64x8xf32> -> vector<64x8xf32>
    %56 = arith.addf %49, %55 : vector<64x8xf32>
    %c0_64 = arith.constant 0 : index
    %c0_65 = arith.constant 0 : index
    %c2_66 = arith.constant 2 : index
    %c2_67 = arith.constant 2 : index
    %c0_68 = arith.constant 0 : index
    %57 = vector.load %arg2[%c0_64, %c0_65, %c2_66, %c2_67, %c0_68] : memref<1x1x10x10x8xf32, #tpu.memory_space<vmem>>, vector<1x1x8x8x8xf32>
    %58 = vector.shape_cast %57 : vector<1x1x8x8x8xf32> to vector<8x8x8xf32>
    %59 = vector.shape_cast %58 : vector<8x8x8xf32> to vector<64x8xf32>
    %c8 = arith.constant 8 : index
    %c0_69 = arith.constant 0 : index
    %c0_70 = arith.constant 0 : index
    %60 = vector.load %arg3[%c8, %c0_69, %c0_70] : memref<9x8x8xf32, #tpu.memory_space<vmem>>, vector<1x8x8xf32>
    %61 = vector.shape_cast %60 : vector<1x8x8xf32> to vector<8x8xf32>
    %cst_71 = arith.constant dense<0.000000e+00> : vector<64x8xf32>
    %62 = tpu.matmul %59, %61, %cst_71 {dimension_numbers = #tpu.dot_dimension_numbers<[1], [0], [0], [1], [0, 0, 1, 1], [], []>} : vector<64x8xf32>, vector<8x8xf32>, vector<64x8xf32> -> vector<64x8xf32>
    %63 = arith.addf %56, %62 : vector<64x8xf32>
    %c0_72 = arith.constant 0 : index
    %c0_73 = arith.constant 0 : index
    %c0_74 = arith.constant 0 : index
    %64 = vector.load %arg4[%c0_72, %c0_73, %c0_74] : memref<1x64x8xf32, #tpu.memory_space<vmem>>, vector<1x64x8xf32>
    %65 = vector.shape_cast %64 : vector<1x64x8xf32> to vector<64x8xf32>
    %66 = vector.shape_cast %63 : vector<64x8xf32> to vector<1x64x8xf32>
    tpu.vector_store %arg4[%c0_72, %c0_73, %c0_74], %66 {strides = array<i32>} : memref<1x64x8xf32, #tpu.memory_space<vmem>>, vector<1x64x8xf32>,
    %cst_75 = arith.constant dense<0.000000e+00> : vector<8xf32>
    %67 = vector.multi_reduction <add>, %63, %cst_75 [0] : vector<64x8xf32> to vector<8xf32>
    %68 = vector.shape_cast %67 : vector<8xf32> to vector<1x8xf32>
    %69 = arith.mulf %63, %63 : vector<64x8xf32>
    %cst_76 = arith.constant dense<0.000000e+00> : vector<8xf32>
    %70 = vector.multi_reduction <add>, %69, %cst_76 [0] : vector<64x8xf32> to vector<8xf32>
    %71 = vector.shape_cast %70 : vector<8xf32> to vector<1x8xf32>
    %c0_i32 = arith.constant 0 : i32
    %72 = arith.cmpi eq, %arg1, %c0_i32 : i32
    %73 = arith.extui %72 : i1 to i32
    %c0_i32_77 = arith.constant 0 : i32
    %74 = arith.cmpi ne, %73, %c0_i32_77 : i32
    scf.if %74 {
      %c0_80 = arith.constant 0 : index
      %c0_81 = arith.constant 0 : index
      %c0_82 = arith.constant 0 : index
      %78 = vector.load %arg5[%c0_80, %c0_81, %c0_82] : memref<1x1x8xf32, #tpu.memory_space<vmem>>, vector<1x1x8xf32>
      %79 = vector.shape_cast %78 : vector<1x1x8xf32> to vector<1x8xf32>
      %80 = vector.shape_cast %68 : vector<1x8xf32> to vector<1x1x8xf32>
      tpu.vector_store %arg5[%c0_80, %c0_81, %c0_82], %80 {strides = array<i32>} : memref<1x1x8xf32, #tpu.memory_space<vmem>>, vector<1x1x8xf32>,
      %c0_83 = arith.constant 0 : index
      %c0_84 = arith.constant 0 : index
      %c0_85 = arith.constant 0 : index
      %81 = vector.load %arg6[%c0_83, %c0_84, %c0_85] : memref<1x1x8xf32, #tpu.memory_space<vmem>>, vector<1x1x8xf32>
      %82 = vector.shape_cast %81 : vector<1x1x8xf32> to vector<1x8xf32>
      %83 = vector.shape_cast %71 : vector<1x8xf32> to vector<1x1x8xf32>
      tpu.vector_store %arg6[%c0_83, %c0_84, %c0_85], %83 {strides = array<i32>} : memref<1x1x8xf32, #tpu.memory_space<vmem>>, vector<1x1x8xf32>,
    } else {
    }
    %c0_i32_78 = arith.constant 0 : i32
    %75 = arith.cmpi sgt, %arg1, %c0_i32_78 : i32
    %76 = arith.extui %75 : i1 to i32
    %c0_i32_79 = arith.constant 0 : i32
    %77 = arith.cmpi ne, %76, %c0_i32_79 : i32
    scf.if %77 {
      %c0_80 = arith.constant 0 : index
      %c0_81 = arith.constant 0 : index
      %c0_82 = arith.constant 0 : index
      %78 = vector.load %arg5[%c0_80, %c0_81, %c0_82] : memref<1x1x8xf32, #tpu.memory_space<vmem>>, vector<1x1x8xf32>
      %79 = vector.shape_cast %78 : vector<1x1x8xf32> to vector<1x8xf32>
      %80 = arith.addf %79, %68 : vector<1x8xf32>
      %c0_83 = arith.constant 0 : index
      %c0_84 = arith.constant 0 : index
      %c0_85 = arith.constant 0 : index
      %81 = vector.load %arg5[%c0_83, %c0_84, %c0_85] : memref<1x1x8xf32, #tpu.memory_space<vmem>>, vector<1x1x8xf32>
      %82 = vector.shape_cast %81 : vector<1x1x8xf32> to vector<1x8xf32>
      %83 = vector.shape_cast %80 : vector<1x8xf32> to vector<1x1x8xf32>
      tpu.vector_store %arg5[%c0_83, %c0_84, %c0_85], %83 {strides = array<i32>} : memref<1x1x8xf32, #tpu.memory_space<vmem>>, vector<1x1x8xf32>,
      %c0_86 = arith.constant 0 : index
      %c0_87 = arith.constant 0 : index
      %c0_88 = arith.constant 0 : index
      %84 = vector.load %arg6[%c0_86, %c0_87, %c0_88] : memref<1x1x8xf32, #tpu.memory_space<vmem>>, vector<1x1x8xf32>
      %85 = vector.shape_cast %84 : vector<1x1x8xf32> to vector<1x8xf32>
      %86 = arith.addf %85, %71 : vector<1x8xf32>
      %c0_89 = arith.constant 0 : index
      %c0_90 = arith.constant 0 : index
      %c0_91 = arith.constant 0 : index
      %87 = vector.load %arg6[%c0_89, %c0_90, %c0_91] : memref<1x1x8xf32, #tpu.memory_space<vmem>>, vector<1x1x8xf32>
      %88 = vector.shape_cast %87 : vector<1x1x8xf32> to vector<1x8xf32>
      %89 = vector.shape_cast %86 : vector<1x8xf32> to vector<1x1x8xf32>
      tpu.vector_store %arg6[%c0_89, %c0_90, %c0_91], %89 {strides = array<i32>} : memref<1x1x8xf32, #tpu.memory_space<vmem>>, vector<1x1x8xf32>,
    } else {
    }
    return
  }
  func.func @transform_0(%arg0: i32, %arg1: i32) -> (i32, i32, i32, i32, i32) {
    %c0_i32 = arith.constant 0 : i32
    %c0_i32_0 = arith.constant 0 : i32
    %c0_i32_1 = arith.constant 0 : i32
    %c0_i32_2 = arith.constant 0 : i32
    return %arg0, %arg1, %c0_i32, %c0_i32_0, %c0_i32_1 : i32, i32, i32, i32, i32
  }
  func.func @transform_1(%arg0: i32, %arg1: i32) -> (i32, i32, i32) {
    %c0_i32 = arith.constant 0 : i32
    %c0_i32_0 = arith.constant 0 : i32
    %c0_i32_1 = arith.constant 0 : i32
    %c0_i32_2 = arith.constant 0 : i32
    return %c0_i32, %c0_i32_0, %c0_i32_1 : i32, i32, i32
  }
  func.func @transform_2(%arg0: i32, %arg1: i32) -> (i32, i32, i32) {
    %c0_i32 = arith.constant 0 : i32
    %c0_i32_0 = arith.constant 0 : i32
    return %arg0, %arg1, %c0_i32 : i32, i32, i32
  }
  func.func @transform_3(%arg0: i32, %arg1: i32) -> (i32, i32, i32) {
    %c0_i32 = arith.constant 0 : i32
    %c0_i32_0 = arith.constant 0 : i32
    %c0_i32_1 = arith.constant 0 : i32
    return %arg0, %c0_i32, %c0_i32_0 : i32, i32, i32
  }
  func.func @transform_4(%arg0: i32, %arg1: i32) -> (i32, i32, i32) {
    %c0_i32 = arith.constant 0 : i32
    %c0_i32_0 = arith.constant 0 : i32
    %c0_i32_1 = arith.constant 0 : i32
    return %arg0, %c0_i32, %c0_i32_0 : i32, i32, i32
  }
}

module attributes {stable_mosaic.version = 11 : i64} {
  func.func @kernel(%arg0: i32, %arg1: i32, %arg2: memref<1x64x8xf32, #tpu.memory_space<vmem>>, %arg3: memref<1x1x8xf32, #tpu.memory_space<vmem>>, %arg4: memref<1x1x8xf32, #tpu.memory_space<vmem>>, %arg5: memref<1x64x8xf32, #tpu.memory_space<vmem>>, %arg6: memref<1x64x8xf32, #tpu.memory_space<vmem>>) attributes {dimension_semantics = [#tpu.dimension_semantics<parallel>, #tpu.dimension_semantics<parallel>], iteration_bounds = array<i64: 2, 1>, scalar_prefetch = 0 : i64, scratch_operands = 0 : i64, tpu.core_type = #tpu.core_type<tc>, window_params = [{transform_indices = @transform_0, window_bounds = array<i64: 1, 64, 8>}, {transform_indices = @transform_1, window_bounds = array<i64: 1, 1, 8>}, {transform_indices = @transform_2, window_bounds = array<i64: 1, 1, 8>}, {transform_indices = @transform_3, window_bounds = array<i64: 1, 64, 8>}, {transform_indices = @transform_4, window_bounds = array<i64: 1, 64, 8>}]} {
    %c0 = arith.constant 0 : index
    %c0_0 = arith.constant 0 : index
    %c0_1 = arith.constant 0 : index
    %0 = vector.load %arg2[%c0, %c0_0, %c0_1] : memref<1x64x8xf32, #tpu.memory_space<vmem>>, vector<1x64x8xf32>
    %1 = vector.shape_cast %0 : vector<1x64x8xf32> to vector<64x8xf32>
    %c0_2 = arith.constant 0 : index
    %c0_3 = arith.constant 0 : index
    %c0_4 = arith.constant 0 : index
    %2 = vector.load %arg3[%c0_2, %c0_3, %c0_4] : memref<1x1x8xf32, #tpu.memory_space<vmem>>, vector<1x1x8xf32>
    %3 = vector.shape_cast %2 : vector<1x1x8xf32> to vector<1x8xf32>
    %cst = arith.constant 1.562500e-02 : f32
    %4 = vector.broadcast %cst : f32 to vector<1x8xf32>
    %5 = arith.mulf %3, %4 : vector<1x8xf32>
    %c0_5 = arith.constant 0 : index
    %c0_6 = arith.constant 0 : index
    %c0_7 = arith.constant 0 : index
    %6 = vector.load %arg4[%c0_5, %c0_6, %c0_7] : memref<1x1x8xf32, #tpu.memory_space<vmem>>, vector<1x1x8xf32>
    %7 = vector.shape_cast %6 : vector<1x1x8xf32> to vector<1x8xf32>
    %cst_8 = arith.constant 1.562500e-02 : f32
    %8 = vector.broadcast %cst_8 : f32 to vector<1x8xf32>
    %9 = arith.mulf %7, %8 : vector<1x8xf32>
    %10 = arith.mulf %5, %5 : vector<1x8xf32>
    %11 = arith.subf %9, %10 : vector<1x8xf32>
    %cst_9 = arith.constant 0.000000e+00 : f32
    %12 = vector.broadcast %cst_9 : f32 to vector<1x8xf32>
    %13 = arith.maximumf %11, %12 : vector<1x8xf32>
    %cst_10 = arith.constant 9.99999974E-6 : f32
    %14 = vector.broadcast %cst_10 : f32 to vector<1x8xf32>
    %15 = arith.addf %13, %14 : vector<1x8xf32>
    %16 = math.rsqrt %15 : vector<1x8xf32>
    %17 = vector.broadcast %5 : vector<1x8xf32> to vector<64x8xf32>
    %18 = arith.subf %1, %17 : vector<64x8xf32>
    %19 = vector.broadcast %16 : vector<1x8xf32> to vector<64x8xf32>
    %20 = arith.mulf %18, %19 : vector<64x8xf32>
    %c0_11 = arith.constant 0 : index
    %c0_12 = arith.constant 0 : index
    %c0_13 = arith.constant 0 : index
    %21 = vector.load %arg5[%c0_11, %c0_12, %c0_13] : memref<1x64x8xf32, #tpu.memory_space<vmem>>, vector<1x64x8xf32>
    %22 = vector.shape_cast %21 : vector<1x64x8xf32> to vector<64x8xf32>
    %23 = arith.addf %20, %22 : vector<64x8xf32>
    %c0_14 = arith.constant 0 : index
    %c0_15 = arith.constant 0 : index
    %c0_16 = arith.constant 0 : index
    %24 = vector.load %arg6[%c0_14, %c0_15, %c0_16] : memref<1x64x8xf32, #tpu.memory_space<vmem>>, vector<1x64x8xf32>
    %25 = vector.shape_cast %24 : vector<1x64x8xf32> to vector<64x8xf32>
    %26 = vector.shape_cast %23 : vector<64x8xf32> to vector<1x64x8xf32>
    tpu.vector_store %arg6[%c0_14, %c0_15, %c0_16], %26 {strides = array<i32>} : memref<1x64x8xf32, #tpu.memory_space<vmem>>, vector<1x64x8xf32>,
    return
  }
  func.func @transform_0(%arg0: i32, %arg1: i32) -> (i32, i32, i32) {
    %c0_i32 = arith.constant 0 : i32
    %c0_i32_0 = arith.constant 0 : i32
    return %arg0, %arg1, %c0_i32 : i32, i32, i32
  }
  func.func @transform_1(%arg0: i32, %arg1: i32) -> (i32, i32, i32) {
    %c0_i32 = arith.constant 0 : i32
    %c0_i32_0 = arith.constant 0 : i32
    %c0_i32_1 = arith.constant 0 : i32
    return %arg0, %c0_i32, %c0_i32_0 : i32, i32, i32
  }
  func.func @transform_2(%arg0: i32, %arg1: i32) -> (i32, i32, i32) {
    %c0_i32 = arith.constant 0 : i32
    %c0_i32_0 = arith.constant 0 : i32
    %c0_i32_1 = arith.constant 0 : i32
    return %arg0, %c0_i32, %c0_i32_0 : i32, i32, i32
  }
  func.func @transform_3(%arg0: i32, %arg1: i32) -> (i32, i32, i32) {
    %c0_i32 = arith.constant 0 : i32
    %c0_i32_0 = arith.constant 0 : i32
    return %arg0, %arg1, %c0_i32 : i32, i32, i32
  }
  func.func @transform_4(%arg0: i32, %arg1: i32) -> (i32, i32, i32) {
    %c0_i32 = arith.constant 0 : i32
    %c0_i32_0 = arith.constant 0 : i32
    return %arg0, %arg1, %c0_i32 : i32, i32, i32
  }
}

module attributes {stable_mosaic.version = 11 : i64} {
  func.func @kernel(%arg0: i32, %arg1: i32, %arg2: memref<1x64x8xf32, #tpu.memory_space<vmem>>, %arg3: memref<1x1x8xf32, #tpu.memory_space<vmem>>, %arg4: memref<1x1x8xf32, #tpu.memory_space<vmem>>, %arg5: memref<1x64x8xf32, #tpu.memory_space<vmem>>) attributes {dimension_semantics = [#tpu.dimension_semantics<parallel>, #tpu.dimension_semantics<parallel>], iteration_bounds = array<i64: 2, 1>, scalar_prefetch = 0 : i64, scratch_operands = 0 : i64, tpu.core_type = #tpu.core_type<tc>, window_params = [{transform_indices = @transform_0, window_bounds = array<i64: 1, 64, 8>}, {transform_indices = @transform_1, window_bounds = array<i64: 1, 1, 8>}, {transform_indices = @transform_2, window_bounds = array<i64: 1, 1, 8>}, {transform_indices = @transform_3, window_bounds = array<i64: 1, 64, 8>}]} {
    %c0 = arith.constant 0 : index
    %c0_0 = arith.constant 0 : index
    %c0_1 = arith.constant 0 : index
    %0 = vector.load %arg2[%c0, %c0_0, %c0_1] : memref<1x64x8xf32, #tpu.memory_space<vmem>>, vector<1x64x8xf32>
    %1 = vector.shape_cast %0 : vector<1x64x8xf32> to vector<64x8xf32>
    %c0_2 = arith.constant 0 : index
    %c0_3 = arith.constant 0 : index
    %c0_4 = arith.constant 0 : index
    %2 = vector.load %arg3[%c0_2, %c0_3, %c0_4] : memref<1x1x8xf32, #tpu.memory_space<vmem>>, vector<1x1x8xf32>
    %3 = vector.shape_cast %2 : vector<1x1x8xf32> to vector<1x8xf32>
    %cst = arith.constant 1.562500e-02 : f32
    %4 = vector.broadcast %cst : f32 to vector<1x8xf32>
    %5 = arith.mulf %3, %4 : vector<1x8xf32>
    %c0_5 = arith.constant 0 : index
    %c0_6 = arith.constant 0 : index
    %c0_7 = arith.constant 0 : index
    %6 = vector.load %arg4[%c0_5, %c0_6, %c0_7] : memref<1x1x8xf32, #tpu.memory_space<vmem>>, vector<1x1x8xf32>
    %7 = vector.shape_cast %6 : vector<1x1x8xf32> to vector<1x8xf32>
    %cst_8 = arith.constant 1.562500e-02 : f32
    %8 = vector.broadcast %cst_8 : f32 to vector<1x8xf32>
    %9 = arith.mulf %7, %8 : vector<1x8xf32>
    %10 = arith.mulf %5, %5 : vector<1x8xf32>
    %11 = arith.subf %9, %10 : vector<1x8xf32>
    %cst_9 = arith.constant 0.000000e+00 : f32
    %12 = vector.broadcast %cst_9 : f32 to vector<1x8xf32>
    %13 = arith.maximumf %11, %12 : vector<1x8xf32>
    %cst_10 = arith.constant 9.99999974E-6 : f32
    %14 = vector.broadcast %cst_10 : f32 to vector<1x8xf32>
    %15 = arith.addf %13, %14 : vector<1x8xf32>
    %16 = math.rsqrt %15 : vector<1x8xf32>
    %17 = vector.broadcast %5 : vector<1x8xf32> to vector<64x8xf32>
    %18 = arith.subf %1, %17 : vector<64x8xf32>
    %19 = vector.broadcast %16 : vector<1x8xf32> to vector<64x8xf32>
    %20 = arith.mulf %18, %19 : vector<64x8xf32>
    %cst_11 = arith.constant 0.000000e+00 : f32
    %21 = vector.broadcast %cst_11 : f32 to vector<64x8xf32>
    %22 = arith.maximumf %20, %21 : vector<64x8xf32>
    %c0_12 = arith.constant 0 : index
    %c0_13 = arith.constant 0 : index
    %c0_14 = arith.constant 0 : index
    %23 = vector.load %arg5[%c0_12, %c0_13, %c0_14] : memref<1x64x8xf32, #tpu.memory_space<vmem>>, vector<1x64x8xf32>
    %24 = vector.shape_cast %23 : vector<1x64x8xf32> to vector<64x8xf32>
    %25 = vector.shape_cast %22 : vector<64x8xf32> to vector<1x64x8xf32>
    tpu.vector_store %arg5[%c0_12, %c0_13, %c0_14], %25 {strides = array<i32>} : memref<1x64x8xf32, #tpu.memory_space<vmem>>, vector<1x64x8xf32>,
    return
  }
  func.func @transform_0(%arg0: i32, %arg1: i32) -> (i32, i32, i32) {
    %c0_i32 = arith.constant 0 : i32
    %c0_i32_0 = arith.constant 0 : i32
    return %arg0, %arg1, %c0_i32 : i32, i32, i32
  }
  func.func @transform_1(%arg0: i32, %arg1: i32) -> (i32, i32, i32) {
    %c0_i32 = arith.constant 0 : i32
    %c0_i32_0 = arith.constant 0 : i32
    %c0_i32_1 = arith.constant 0 : i32
    return %arg0, %c0_i32, %c0_i32_0 : i32, i32, i32
  }
  func.func @transform_2(%arg0: i32, %arg1: i32) -> (i32, i32, i32) {
    %c0_i32 = arith.constant 0 : i32
    %c0_i32_0 = arith.constant 0 : i32
    %c0_i32_1 = arith.constant 0 : i32
    return %arg0, %c0_i32, %c0_i32_0 : i32, i32, i32
  }
  func.func @transform_3(%arg0: i32, %arg1: i32) -> (i32, i32, i32) {
    %c0_i32 = arith.constant 0 : i32
    %c0_i32_0 = arith.constant 0 : i32
    return %arg0, %arg1, %c0_i32 : i32, i32, i32
  }
}

</mosaic_0001>

<bundles_post_ra>
// kernel: pyramid_block.19
= control target key start
LH: loop header
LB: loop body
LE: loop exit
PB: predicated region body
PF: predicated region fallthrough
CT: control target
= control target key end

     0   :  { %s483_s12 = smov 0   ;;  %s485_s13 = smov 0   ;;  %s535_s0 = inlined_call_operand.vmem [shape: f32[2,64,8], index: 0, kind: input, shape index: {}]   ;;  %s536_s1 = inlined_call_operand.vmem [shape: f32[2,1,8], index: 1, kind: input, shape index: {}]   ;;  %s537_s2 = inlined_call_operand.vmem [shape: f32[2,1,8], index: 2, kind: input, shape index: {}]   ;;  %s538_s3 = inlined_call_operand.vmem [shape: f32[2,64,8], index: 3, kind: output, shape index: {}]  }
   0x1   :  { %s487_s14 = smov 0  }
   0x2 LB: > { %s25_s15 = sadd.s32 1, %s457_s13  ;;  %p404_p0 = scmp.ge.s32.totalorder %s461_s14, 1  ;;  %s461_s14 = sphi %s487_s14, %s13_s14   ;;  %s457_s13 = sphi %s485_s13, %s540_s13   ;;  %s453_s12 = sphi %s483_s12, %s539_s12  }
   0x3   : > { %p27_p1 = scmp.ge.s32.totalorder %s25_s15, 2  ;;  %p174_p2 = scmp.lt.s32.totalorder %s461_s14, 3 }
   0x5   : > { %s542_s15 = smov (%p27_p1, %s25_s15), 0  ;;  %p175_p3 = pnand %p404_p0, %p174_p2 }
   0x6   : > { %p213_p4 = scmp.lt.s32.totalorder (!%p175_p3), %s453_s12, 1 }
   0x7   : > { %178 = sbr.rel (%p175_p3) target bundleno = 55 (0x37), region = 32 }
   0xc   : > { %s544_s12 = smov (!%p213_p4, %s453_s12), 1  ;;  %vm286_vm3 = vcmask 64512  }
   0xd   : > { %s224_s18 = scalar_lea.vmem %s536_s1, %s544_s12  ;;  %s227_s21 = scalar_lea.vmem %s537_s2, %s544_s12 }
   0xe   : > { %v246_v0 = vld [vmem:[%s224_s18] sm:$0x1]  ;;  %s411_s22 = sshll.u32 %s544_s12, 6 }
   0xf   : > { %v247_v1 = vmul.f32 0.015625, %v246_v0  ;;  %v248_v2 = vld [vmem:[%s227_s21] sm:$0x1]  ;;  %s220_s25 = scalar_lea.vmem %s535_s0, %s411_s22  ;;  %s236_s28 = scalar_lea.vmem %s538_s3, %s411_s22 }
  0x10   : > { %v249_v3 = vmul.f32 0.015625, %v248_v2  ;;  %v238_v13 = vld [vmem:[%s220_s25] sm:$0xff]  ;;  %v239_v15 = vld [vmem:[%s220_s25 + $0x8] sm:$0xff]  ;;  %v240_v16 = vld [vmem:[%s220_s25 + $0x10] sm:$0xff] }
  0x11   : > { %v250_v4 = vmul.f32 %v247_v1, %v247_v1  ;;  %v265_v12 = vperm.slane %v247_v1, 0  ;;  %v241_v17 = vld [vmem:[%s220_s25 + $0x18] sm:$0xff]  ;;  %v242_v19 = vld [vmem:[%s220_s25 + $0x20] sm:$0xff]  ;;  %v243_v23 = vld [vmem:[%s220_s25 + $0x28] sm:$0xff] }
  0x12   : > { %v244_v26 = vld [vmem:[%s220_s25 + $0x30] sm:$0xff]  ;;  %v245_v29 = vld [vmem:[%s220_s25 + $0x38] sm:$0xff] }
  0x13   : > { %v251_v5 = vsub.f32 %v249_v3, %v250_v4  ;;  %v267_v20 = vsub.f32 %v238_v13, %v265_v12  ;;  %v268_v21 = vsub.f32 %v239_v15, %v265_v12  ;;  %v269_v22 = vsub.f32 %v240_v16, %v265_v12 }
  0x14   : > { %v270_v25 = vsub.f32 %v241_v17, %v265_v12  ;;  %v271_v28 = vsub.f32 %v242_v19, %v265_v12  ;;  %v272_v30 = vsub.f32 %v243_v23, %v265_v12  ;;  %v273_v34 = vsub.f32 %v244_v26, %v265_v12 }
  0x15   : > { %v252_v6 = vmax.f32 %v251_v5, 0.0  ;;  %v274_v36 = vsub.f32 %v245_v29, %v265_v12 }
  0x17   : > { %v253_v7 = vadd.f32 1e-05, %v252_v6 }
  0x19   : > { %437 = vrsqrt.f32 %v253_v7  ;;  %vm260_vm0 = vweird.f32 %v253_v7 }
  0x1f   : > { %v438_v8 = vpop.eup %437 }
  0x20   : > { %v255_v9 = vmul.f32 %v438_v8, %v253_v7  ;;  %vm261_vm1 = vweird.f32 %v438_v8 }
  0x21   : > { %vm262_vm2 = vmor %vm260_vm0, %vm261_vm1 }
  0x22   : > { %v256_v10 = vmul.f32 %v438_v8, %v255_v9 }
  0x24   : > { %v257_v11 = vmul.f32 0.5, %v256_v10 }
  0x26   : > { %v258_v14 = vsub.f32 1.5, %v257_v11 }
  0x28   : > { %v259_v18 = vmul.f32 %v438_v8, %v258_v14 }
  0x2a   : > { %v263_v24 = vsel %vm262_vm2, %v438_v8, %v259_v18 }
  0x2b   : > { %v276_v27 = vperm.slane %v263_v24, 0 }
  0x2d   : > { %v278_v31 = vmul.f32 %v276_v27, %v267_v20  ;;  %v279_v32 = vmul.f32 %v276_v27, %v268_v21  ;;  %v280_v33 = vmul.f32 %v276_v27, %v269_v22  ;;  %v281_v35 = vmul.f32 %v276_v27, %v270_v25 }
  0x2e   : > { %v282_v37 = vmul.f32 %v276_v27, %v271_v28  ;;  %v283_v38 = vmul.f32 %v276_v27, %v272_v30  ;;  %v284_v39 = vmul.f32 %v276_v27, %v273_v34  ;;  %v285_v40 = vmul.f32 %v276_v27, %v274_v36 }
  0x2f   : > { %287 = vst.msk [vmem:[%s236_s28] sm:$0xff] %vm286_vm3, %v278_v31 }
  0x30   : > { %288 = vst.msk [vmem:[%s236_s28 + $0x8] sm:$0xff] %vm286_vm3, %v279_v32 }
  0x31   : > { %289 = vst.msk [vmem:[%s236_s28 + $0x10] sm:$0xff] %vm286_vm3, %v280_v33 }
  0x32   : > { %290 = vst.msk [vmem:[%s236_s28 + $0x18] sm:$0xff] %vm286_vm3, %v281_v35 }
  0x33   : > { %291 = vst.msk [vmem:[%s236_s28 + $0x20] sm:$0xff] %vm286_vm3, %v282_v37 }
  0x34   : > { %292 = vst.msk [vmem:[%s236_s28 + $0x28] sm:$0xff] %vm286_vm3, %v283_v38 }
  0x35   : > { %293 = vst.msk [vmem:[%s236_s28 + $0x30] sm:$0xff] %vm286_vm3, %v284_v39 }
  0x36   : > { %294 = vst.msk [vmem:[%s236_s28 + $0x38] sm:$0xff] %vm286_vm3, %v285_v40 }
  0x37 PF: > { %s13_s14 = sadd.s32 1, %s461_s14   ;;  %s539_s12 = smov %s457_s13 }
  0x38   : > { %p10_p5 = scmp.ge.s32.totalorder %s13_s14, 4   ;;  %s540_s13 = smov %s542_s15 }
  0x3a   :  { %12 = sbr.rel (!%p10_p5) target bundleno = 2 (0x2), region = 68 }

// kernel: pyramid_block.18
= control target key start
LH: loop header
LB: loop body
LE: loop exit
PB: predicated region body
PF: predicated region fallthrough
CT: control target
= control target key end

     0   :  { %s1593_s15 = smov 0   ;;  %s1595_s16 = smov 0   ;;  %s1926_s0 = inlined_call_operand.vmem [shape: f32[2,1,17,18,4], index: 0, kind: input, shape index: {}]   ;;  %s1927_s1 = inlined_call_operand.vmem [shape: f32[9,4,8], index: 1, kind: input, shape index: {}]   ;;  %s1928_s2 = inlined_call_operand.vmem [shape: f32[2,64,8], index: 2, kind: output, shape index: {0}]   ;;  %s1929_s3 = inlined_call_operand.vmem [shape: f32[2,1,8], index: 3, kind: output, shape index: {1}]   ;;  %s1930_s4 = inlined_call_operand.vmem [shape: f32[2,1,8], index: 4, kind: output, shape index: {2}]  }
   0x1   :  { %s1597_s17 = smov 0  }
   0x2 LB: > { %s27_s18 = sadd.s32 1, %s1562_s16  ;;  %p1349_p0 = scmp.ge.s32.totalorder %s1566_s17, 1  ;;  %s1566_s17 = sphi %s1597_s17, %s15_s17   ;;  %s1562_s16 = sphi %s1595_s16, %s1932_s16   ;;  %s1558_s15 = sphi %s1593_s15, %s1931_s15  }
   0x3   : > { %p29_p1 = scmp.ge.s32.totalorder %s27_s18, 2  ;;  %p187_p2 = scmp.lt.s32.totalorder %s1566_s17, 3 }
   0x5   : > { %s1934_s18 = smov (%p29_p1, %s27_s18), 0  ;;  %p188_p3 = pnand %p1349_p0, %p187_p2 }
   0x6   : > { %p227_p4 = scmp.lt.s32.totalorder (!%p188_p3), %s1558_s15, 1 }
   0x7   : > { %191 = sbr.rel (%p188_p3) target bundleno = 311 (0x137), region = 28 }
   0xc   : > { %v1368_v0 = vld [vmem:[%s1927_s1 + $0x4] sm:$0xf]  ;;  %vm311_vm0 = vcmask 1043456   ;;  %v1395_v1 = vld [vmem:[%s1927_s1 + $0x8] sm:$0xf]  ;;  %s1936_s15 = smov (!%p227_p4, %s1558_s15), 1 }
   0xd   : > { %1516 = vmatpush.msk.msra.mxu1 %vm311_vm0, %v1368_v0  ;;  %1517 = vmatpush.msk.msra.mxu2 %vm311_vm0, %v1368_v0  ;;  %v1413_v2 = vld [vmem:[%s1927_s1 + $0xc] sm:$0xf]  ;;  %v267_v3 = vld [vmem:[%s1927_s1] sm:$0xf]  ;;  %v1431_v4 = vld [vmem:[%s1927_s1 + $0x10] sm:$0xf]  ;;  %s248_s25 = scalar_lea.vmem %s1929_s3, %s1936_s15  ;;  %s251_s28 = scalar_lea.vmem %s1930_s4, %s1936_s15 }
   0xe   : > { %1518 = vmatpush.msk.msra.mxu3 %vm311_vm0, %v1368_v0  ;;  %s1519_s29 = smul.u32 408, %s1936_s15  ;;  %1369 = vmatpush.msk.msra.mxu0 %vm311_vm0, %v1368_v0  ;;  %vm286_vm1 = vcmask 31744   ;;  %v1467_v5 = vld [vmem:[%s1927_s1 + $0x18] sm:$0xf]  ;;  %v1485_v6 = vld [vmem:[%s1927_s1 + $0x1c] sm:$0xf] }
   0xf   : > { %1396 = vmatpush.msk.msrb.mxu2 %vm311_vm0, %v1395_v1  ;;  %1378 = vmatpush.msk.msrb.mxu1 %vm311_vm0, %v267_v3  ;;  %v1449_v11 = vld [vmem:[%s1927_s1 + $0x14] sm:$0xf]  ;;  %v1503_v12 = vld [vmem:[%s1927_s1 + $0x20] sm:$0xf]  ;;  %s1515_s19 = sshll.u32 %s1936_s15, 6  ;;  %vm1082_vm2 = vcmask 64512  }
  0x10   : > { %1414 = vmatpush.msk.msrb.mxu3 %vm311_vm0, %v1413_v2  ;;  %1432 = vmatpush.msk.msrb.mxu0 %vm311_vm0, %v1431_v4  ;;  %s1640_s6 = scalar_lea.vmem %s1926_s0, %s1519_s29  ;;  %s1853_s22 = scalar_lea.vmem %s1928_s2, %s1515_s19  ;;  %vm1145_vm3 = vcmask 57344  }
  0x11   : > { %v1362_v7 = vld [vmem:[%s1640_s6 + $0x61] ss:$2 sm:$0xff]  ;;  %v1363_v13 = vld [vmem:[%s1640_s6 + $0x91] ss:$2 sm:$0xff]  ;;  %v252_v17 = vld [vmem:[%s1640_s6] ss:$2 sm:$0xff] }
  0x12   : > { %v1364_v8 = vld [vmem:[%s1640_s6 + $0xc1] ss:$2 sm:$0xff]  ;;  %1372 = vmatmul.msk.f32.vlgmr.msra.gmra.mxu1 %vm286_vm1, %v1362_v7  ;;  %v1365_v14 = vld [vmem:[%s1640_s6 + $0xf1] ss:$2 sm:$0xff]  ;;  %v1387_v18 = vld [vmem:[%s1640_s6 + $0x2] ss:$2 sm:$0xff] }
  0x13   : > { %v1366_v9 = vld [vmem:[%s1640_s6 + $0x121] ss:$2 sm:$0xff]  ;;  %1374 = vmatmul.msk.f32.vlgmr.msra.gmra.mxu2 %vm286_vm1, %v1364_v8  ;;  %1450 = vmatpush.msk.msra.mxu1 %vm311_vm0, %v1449_v11  ;;  %v1367_v15 = vld [vmem:[%s1640_s6 + $0x151] ss:$2 sm:$0xff]  ;;  %v1405_v19 = vld [vmem:[%s1640_s6 + $0x18] ss:$2 sm:$0xff] }
  0x14   : > { %v1360_v10 = vld [vmem:[%s1640_s6 + $0x1] ss:$2 sm:$0xff]  ;;  %1376 = vmatmul.msk.f32.vlgmr.msra.gmra.mxu3 %vm286_vm1, %v1366_v9  ;;  %1468 = vmatpush.msk.msra.mxu2 %vm311_vm0, %v1467_v5  ;;  %v1361_v16 = vld [vmem:[%s1640_s6 + $0x31] ss:$2 sm:$0xff]  ;;  %v1353_v21 = vld [vmem:[%s1640_s6 + $0x30] ss:$2 sm:$0xff] }
  0x15   : > { %1370 = vmatmul.msk.f32.vlgmr.msra.gmra.mxu0 %vm286_vm1, %v1360_v10  ;;  %1486 = vmatpush.msk.msra.mxu3 %vm311_vm0, %v1485_v6  ;;  %v1423_v20 = vld [vmem:[%s1640_s6 + $0x19] ss:$2 sm:$0xff]  ;;  %v1388_v22 = vld [vmem:[%s1640_s6 + $0x32] ss:$2 sm:$0xff]  ;;  %v1424_v24 = vld [vmem:[%s1640_s6 + $0x49] ss:$2 sm:$0xff] }
  0x16   : > { %1504 = vmatpush.msk.msra.mxu0 %vm311_vm0, %v1503_v12  ;;  %v1406_v23 = vld [vmem:[%s1640_s6 + $0x48] ss:$2 sm:$0xff]  ;;  %v1407_v27 = vld [vmem:[%s1640_s6 + $0x78] ss:$2 sm:$0xff]  ;;  %v1425_v28 = vld [vmem:[%s1640_s6 + $0x79] ss:$2 sm:$0xff] }
  0x17   : > { %v1354_v25 = vld [vmem:[%s1640_s6 + $0x60] ss:$2 sm:$0xff]  ;;  %v1355_v29 = vld [vmem:[%s1640_s6 + $0x90] ss:$2 sm:$0xff]  ;;  %v1426_v32 = vld [vmem:[%s1640_s6 + $0xa9] ss:$2 sm:$0xff] }
  0x18   : > { %v1389_v26 = vld [vmem:[%s1640_s6 + $0x62] ss:$2 sm:$0xff]  ;;  %v1390_v30 = vld [vmem:[%s1640_s6 + $0x92] ss:$2 sm:$0xff]  ;;  %v1427_v36 = vld [vmem:[%s1640_s6 + $0xd9] ss:$2 sm:$0xff] }
  0x19   : > { %v1408_v31 = vld [vmem:[%s1640_s6 + $0xa8] ss:$2 sm:$0xff]  ;;  %v1409_v35 = vld [vmem:[%s1640_s6 + $0xd8] ss:$2 sm:$0xff]  ;;  %v1428_v40 = vld [vmem:[%s1640_s6 + $0x109] ss:$2 sm:$0xff] }
  0x1a   : > { %1373 = vmatmul.msk.f32.gmra.mxu1 %vm286_vm1, %v1363_v13  ;;  %v1356_v33 = vld [vmem:[%s1640_s6 + $0xc0] ss:$2 sm:$0xff]  ;;  %v1357_v37 = vld [vmem:[%s1640_s6 + $0xf0] ss:$2 sm:$0xff]  ;;  %v1429_v44 = vld [vmem:[%s1640_s6 + $0x139] ss:$2 sm:$0xff] }
  0x1b   : > { %1375 = vmatmul.msk.f32.gmra.mxu2 %vm286_vm1, %v1365_v14  ;;  %v1391_v34 = vld [vmem:[%s1640_s6 + $0xc2] ss:$2 sm:$0xff]  ;;  %v1392_v38 = vld [vmem:[%s1640_s6 + $0xf2] ss:$2 sm:$0xff]  ;;  %v1430_v48 = vld [vmem:[%s1640_s6 + $0x169] ss:$2 sm:$0xff] }
  0x1c   : > { %1377 = vmatmul.msk.f32.gmra.mxu3 %vm286_vm1, %v1367_v15  ;;  %v1410_v39 = vld [vmem:[%s1640_s6 + $0x108] ss:$2 sm:$0xff]  ;;  %v1411_v43 = vld [vmem:[%s1640_s6 + $0x138] ss:$2 sm:$0xff]  ;;  %v1477_v51 = vld [vmem:[%s1640_s6 + $0x31] ss:$2 sm:$0xff] }
  0x1d   : > { %1371 = vmatmul.msk.f32.gmra.mxu0 %vm286_vm1, %v1361_v16  ;;  %v1358_v41 = vld [vmem:[%s1640_s6 + $0x120] ss:$2 sm:$0xff]  ;;  %v1359_v45 = vld [vmem:[%s1640_s6 + $0x150] ss:$2 sm:$0xff]  ;;  %v1478_v55 = vld [vmem:[%s1640_s6 + $0x61] ss:$2 sm:$0xff] }
  0x1e   : > { %v1393_v42 = vld [vmem:[%s1640_s6 + $0x122] ss:$2 sm:$0xff]  ;;  %v1394_v46 = vld [vmem:[%s1640_s6 + $0x152] ss:$2 sm:$0xff]  ;;  %v1479_v59 = vld [vmem:[%s1640_s6 + $0x91] ss:$2 sm:$0xff] }
  0x1f   : > { %v1412_v47 = vld [vmem:[%s1640_s6 + $0x168] ss:$2 sm:$0xff]  ;;  %v1480_v63 = vld [vmem:[%s1640_s6 + $0xc1] ss:$2 sm:$0xff]  ;;  %v1481_v3 = vld [vmem:[%s1640_s6 + $0xf1] ss:$2 sm:$0xff] }
  0x20   : > { %v1441_v49 = vld [vmem:[%s1640_s6 + $0x1a] ss:$2 sm:$0xff]  ;;  %v1442_v53 = vld [vmem:[%s1640_s6 + $0x4a] ss:$2 sm:$0xff]  ;;  %v1482_v7 = vld [vmem:[%s1640_s6 + $0x121] ss:$2 sm:$0xff] }
  0x21   : > { %v1459_v50 = vld [vmem:[%s1640_s6 + $0x30] ss:$2 sm:$0xff]  ;;  %v1460_v54 = vld [vmem:[%s1640_s6 + $0x60] ss:$2 sm:$0xff]  ;;  %v1483_v12 = vld [vmem:[%s1640_s6 + $0x151] ss:$2 sm:$0xff] }
  0x22   : > { %1379 = vmatmul.msk.f32.vlgmr.msrb.gmra.mxu1 %vm286_vm1, %v252_v17  ;;  %v1495_v52 = vld [vmem:[%s1640_s6 + $0x32] ss:$2 sm:$0xff]  ;;  %v1496_v56 = vld [vmem:[%s1640_s6 + $0x62] ss:$2 sm:$0xff] }
  0x23   : > { %1397 = vmatmul.msk.f32.vlgmr.msrb.gmra.mxu2 %vm286_vm1, %v1387_v18  ;;  %v1443_v57 = vld [vmem:[%s1640_s6 + $0x7a] ss:$2 sm:$0xff]  ;;  %v1444_v61 = vld [vmem:[%s1640_s6 + $0xaa] ss:$2 sm:$0xff] }
  0x24   : > { %1415 = vmatmul.msk.f32.vlgmr.msrb.gmra.mxu3 %vm286_vm1, %v1405_v19  ;;  %v1461_v58 = vld [vmem:[%s1640_s6 + $0x90] ss:$2 sm:$0xff]  ;;  %v1462_v62 = vld [vmem:[%s1640_s6 + $0xc0] ss:$2 sm:$0xff] }
  0x25   : > { %1433 = vmatmul.msk.f32.vlgmr.msrb.gmra.mxu0 %vm286_vm1, %v1423_v20  ;;  %v1497_v60 = vld [vmem:[%s1640_s6 + $0x92] ss:$2 sm:$0xff]  ;;  %v1498_v0 = vld [vmem:[%s1640_s6 + $0xc2] ss:$2 sm:$0xff]  ;;  %v1484_v20 = vld [vmem:[%s1640_s6 + $0x181] ss:$2 sm:$0xff] }
  0x26   : > { %v1445_v1 = vld [vmem:[%s1640_s6 + $0xda] ss:$2 sm:$0xff]  ;;  %v1446_v5 = vld [vmem:[%s1640_s6 + $0x10a] ss:$2 sm:$0xff] }
  0x27   : > { %v1463_v2 = vld [vmem:[%s1640_s6 + $0xf0] ss:$2 sm:$0xff]  ;;  %v1464_v6 = vld [vmem:[%s1640_s6 + $0x120] ss:$2 sm:$0xff] }
  0x28   : > { %v1499_v4 = vld [vmem:[%s1640_s6 + $0xf2] ss:$2 sm:$0xff]  ;;  %v1500_v8 = vld [vmem:[%s1640_s6 + $0x122] ss:$2 sm:$0xff] }
  0x29   : > { %v1447_v10 = vld [vmem:[%s1640_s6 + $0x13a] ss:$2 sm:$0xff]  ;;  %v1448_v18 = vld [vmem:[%s1640_s6 + $0x16a] ss:$2 sm:$0xff] }
  0x2a   : > { %1380 = vmatmul.msk.f32.gmra.mxu1 %vm286_vm1, %v1353_v21  ;;  %v1465_v11 = vld [vmem:[%s1640_s6 + $0x150] ss:$2 sm:$0xff]  ;;  %v1466_v19 = vld [vmem:[%s1640_s6 + $0x180] ss:$2 sm:$0xff] }
  0x2b   : > { %1398 = vmatmul.msk.f32.gmra.mxu2 %vm286_vm1, %v1388_v22  ;;  %v1501_v14 = vld [vmem:[%s1640_s6 + $0x152] ss:$2 sm:$0xff]  ;;  %v1502_v22 = vld [vmem:[%s1640_s6 + $0x182] ss:$2 sm:$0xff] }
  0x2c   : > { %1416 = vmatmul.msk.f32.gmra.mxu3 %vm286_vm1, %v1406_v23 }
  0x2d   : > { %1434 = vmatmul.msk.f32.gmra.mxu0 %vm286_vm1, %v1424_v24 }
  0x32   : > { %1381 = vmatmul.msk.f32.gmra.mxu1 %vm286_vm1, %v1354_v25 }
  0x33   : > { %1399 = vmatmul.msk.f32.gmra.mxu2 %vm286_vm1, %v1389_v26 }
  0x34   : > { %1417 = vmatmul.msk.f32.gmra.mxu3 %vm286_vm1, %v1407_v27 }
  0x35   : > { %1435 = vmatmul.msk.f32.gmra.mxu0 %vm286_vm1, %v1425_v28 }
  0x3a   : > { %1382 = vmatmul.msk.f32.gmra.mxu1 %vm286_vm1, %v1355_v29 }
  0x3b   : > { %1400 = vmatmul.msk.f32.gmra.mxu2 %vm286_vm1, %v1390_v30 }
  0x3c   : > { %1418 = vmatmul.msk.f32.gmra.mxu3 %vm286_vm1, %v1408_v31 }
  0x3d   : > { %1436 = vmatmul.msk.f32.gmra.mxu0 %vm286_vm1, %v1426_v32 }
  0x42   : > { %1383 = vmatmul.msk.f32.gmra.mxu1 %vm286_vm1, %v1356_v33 }
  0x43   : > { %1401 = vmatmul.msk.f32.gmra.mxu2 %vm286_vm1, %v1391_v34 }
  0x44   : > { %1419 = vmatmul.msk.f32.gmra.mxu3 %vm286_vm1, %v1409_v35 }
  0x45   : > { %1437 = vmatmul.msk.f32.gmra.mxu0 %vm286_vm1, %v1427_v36 }
  0x4a   : > { %1384 = vmatmul.msk.f32.gmra.mxu1 %vm286_vm1, %v1357_v37 }
  0x4b   : > { %1402 = vmatmul.msk.f32.gmra.mxu2 %vm286_vm1, %v1392_v38 }
  0x4c   : > { %1420 = vmatmul.msk.f32.gmra.mxu3 %vm286_vm1, %v1410_v39 }
  0x4d   : > { %1438 = vmatmul.msk.f32.gmra.mxu0 %vm286_vm1, %v1428_v40 }
  0x52   : > { %1385 = vmatmul.msk.f32.gmra.mxu1 %vm286_vm1, %v1358_v41 }
  0x53   : > { %1403 = vmatmul.msk.f32.gmra.mxu2 %vm286_vm1, %v1393_v42 }
  0x54   : > { %1421 = vmatmul.msk.f32.gmra.mxu3 %vm286_vm1, %v1411_v43 }
  0x55   : > { %1439 = vmatmul.msk.f32.gmra.mxu0 %vm286_vm1, %v1429_v44 }
  0x5a   : > { %1386 = vmatmul.msk.f32.gmra.mxu1 %vm286_vm1, %v1359_v45 }
  0x5b   : > { %1404 = vmatmul.msk.f32.gmra.mxu2 %vm286_vm1, %v1394_v46 }
  0x5c   : > { %1422 = vmatmul.msk.f32.gmra.mxu3 %vm286_vm1, %v1412_v47 }
  0x5d   : > { %1440 = vmatmul.msk.f32.gmra.mxu0 %vm286_vm1, %v1430_v48 }
  0x62   : > { %1451 = vmatmul.msk.f32.vlgmr.msra.gmra.mxu1 %vm286_vm1, %v1441_v49 }
  0x63   : > { %1469 = vmatmul.msk.f32.vlgmr.msra.gmra.mxu2 %vm286_vm1, %v1459_v50 }
  0x64   : > { %1487 = vmatmul.msk.f32.vlgmr.msra.gmra.mxu3 %vm286_vm1, %v1477_v51 }
  0x65   : > { %1505 = vmatmul.msk.f32.vlgmr.msra.gmra.mxu0 %vm286_vm1, %v1495_v52 }
  0x6a   : > { %1452 = vmatmul.msk.f32.gmra.mxu1 %vm286_vm1, %v1442_v53 }
  0x6b   : > { %1470 = vmatmul.msk.f32.gmra.mxu2 %vm286_vm1, %v1460_v54 }
  0x6c   : > { %1488 = vmatmul.msk.f32.gmra.mxu3 %vm286_vm1, %v1478_v55 }
  0x6d   : > { %1506 = vmatmul.msk.f32.gmra.mxu0 %vm286_vm1, %v1496_v56 }
  0x72   : > { %1453 = vmatmul.msk.f32.gmra.mxu1 %vm286_vm1, %v1443_v57 }
  0x73   : > { %1471 = vmatmul.msk.f32.gmra.mxu2 %vm286_vm1, %v1461_v58 }
  0x74   : > { %1489 = vmatmul.msk.f32.gmra.mxu3 %vm286_vm1, %v1479_v59 }
  0x75   : > { %1507 = vmatmul.msk.f32.gmra.mxu0 %vm286_vm1, %v1497_v60 }
  0x7a   : > { %1454 = vmatmul.msk.f32.gmra.mxu1 %vm286_vm1, %v1444_v61 }
  0x7b   : > { %1472 = vmatmul.msk.f32.gmra.mxu2 %vm286_vm1, %v1462_v62 }
  0x7c   : > { %1490 = vmatmul.msk.f32.gmra.mxu3 %vm286_vm1, %v1480_v63 }
  0x7d   : > { %1508 = vmatmul.msk.f32.gmra.mxu0 %vm286_vm1, %v1498_v0 }
  0x82   : > { %1455 = vmatmul.msk.f32.gmra.mxu1 %vm286_vm1, %v1445_v1 }
  0x83   : > { %1473 = vmatmul.msk.f32.gmra.mxu2 %vm286_vm1, %v1463_v2 }
  0x84   : > { %1491 = vmatmul.msk.f32.gmra.mxu3 %vm286_vm1, %v1481_v3 }
  0x85   : > { %1509 = vmatmul.msk.f32.gmra.mxu0 %vm286_vm1, %v1499_v4 }
  0x8a   : > { %1456 = vmatmul.msk.f32.gmra.mxu1 %vm286_vm1, %v1446_v5 }
  0x8b   : > { %1474 = vmatmul.msk.f32.gmra.mxu2 %vm286_vm1, %v1464_v6 }
  0x8c   : > { %1492 = vmatmul.msk.f32.gmra.mxu3 %vm286_vm1, %v1482_v7 }
  0x8d   : > { %1510 = vmatmul.msk.f32.gmra.mxu0 %vm286_vm1, %v1500_v8 }
  0x8f   : > { %v1786_v9 = vpop.f32.mrf.mxu1 }
  0x92   : > { %v332_v13 = vpop.f32.mrf.mxu0  ;;  %1457 = vmatmul.msk.f32.gmra.mxu1 %vm286_vm1, %v1447_v10 }
  0x93   : > { %1475 = vmatmul.msk.f32.gmra.mxu2 %vm286_vm1, %v1465_v11 }
  0x94   : > { %1493 = vmatmul.msk.f32.gmra.mxu3 %vm286_vm1, %v1483_v12 }
  0x95   : > { %1511 = vmatmul.msk.f32.gmra.mxu0 %vm286_vm1, %v1501_v14 }
  0x96   : > { %v1796_v15 = vpop.f32.mrf.mxu2 }
  0x97   : > { %v1798_v16 = vpop.f32.mrf.mxu3  ;;  %v1800_v17 = vpop.f32.mrf.mxu1 }
  0x9a   : > { %v335_v21 = vpop.f32.mrf.mxu0  ;;  %1458 = vmatmul.msk.f32.gmra.mxu1 %vm286_vm1, %v1448_v18 }
  0x9b   : > { %1476 = vmatmul.msk.f32.gmra.mxu2 %vm286_vm1, %v1466_v19 }
  0x9c   : > { %1494 = vmatmul.msk.f32.gmra.mxu3 %vm286_vm1, %v1484_v20 }
  0x9d   : > { %1512 = vmatmul.msk.f32.gmra.mxu0 %vm286_vm1, %v1502_v22 }
  0x9e   : > { %v1810_v23 = vpop.f32.mrf.mxu2 }
  0x9f   : > { %v1812_v24 = vpop.f32.mrf.mxu3  ;;  %v400_v25 = vpop.f32.mrf.mxu1 }
  0xa0   : > { %v401_v54 = vadd.f32 %v400_v25, %v332_v13 }
  0xa2   : > { %v674_v26 = vpop.f32.mrf.mxu0 }
  0xa6   : > { %v486_v27 = vpop.f32.mrf.mxu2 }
  0xa7   : > { %v580_v28 = vpop.f32.mrf.mxu3  ;;  %v403_v29 = vpop.f32.mrf.mxu1  ;;  %v510_v56 = vadd.f32 %v486_v27, %v401_v54 }
  0xa8   : > { %v404_v61 = vadd.f32 %v403_v29, %v335_v21 }
  0xa9   : > { %v604_v58 = vadd.f32 %v580_v28, %v510_v56 }
  0xaa   : > { %v677_v30 = vpop.f32.mrf.mxu0 }
  0xab   : > { %v698_v63 = vadd.f32 %v674_v26, %v604_v58 }
  0xae   : > { %v489_v31 = vpop.f32.mrf.mxu2 }
  0xaf   : > { %v583_v32 = vpop.f32.mrf.mxu3  ;;  %v406_v33 = vpop.f32.mrf.mxu1  ;;  %v511_v0 = vadd.f32 %v489_v31, %v404_v61 }
  0xb0   : > { %v407_v7 = vadd.f32 %v406_v33, %v1786_v9 }
  0xb1   : > { %v605_v3 = vadd.f32 %v583_v32, %v511_v0 }
  0xb2   : > { %v680_v34 = vpop.f32.mrf.mxu0 }
  0xb3   : > { %v699_v11 = vadd.f32 %v677_v30, %v605_v3 }
  0xb6   : > { %v492_v35 = vpop.f32.mrf.mxu2 }
  0xb7   : > { %v586_v36 = vpop.f32.mrf.mxu3  ;;  %v409_v37 = vpop.f32.mrf.mxu1  ;;  %v512_v12 = vadd.f32 %v492_v35, %v407_v7 }
  0xb8   : > { %v410_v22 = vadd.f32 %v409_v37, %v1800_v17 }
  0xb9   : > { %v606_v19 = vadd.f32 %v586_v36, %v512_v12 }
  0xba   : > { %v1814_v38 = vpop.f32.mrf.mxu0 }
  0xbb   : > { %v700_v27 = vadd.f32 %v680_v34, %v606_v19 }
  0xbe   : > { %v495_v39 = vpop.f32.mrf.mxu2 }
  0xbf   : > { %v589_v40 = vpop.f32.mrf.mxu3  ;;  %v1816_v41 = vpop.f32.mrf.mxu1  ;;  %v513_v28 = vadd.f32 %v495_v39, %v410_v22 }
  0xc0   : > { %v413_v61 = vadd.f32 %v1816_v41, %v1796_v15 }
  0xc1   : > { %v607_v56 = vadd.f32 %v589_v40, %v513_v28 }
  0xc2   : > { %v1818_v42 = vpop.f32.mrf.mxu0 }
  0xc3   : > { %v701_v0 = vadd.f32 %v1814_v38, %v607_v56 }
  0xc6   : > { %v1820_v43 = vpop.f32.mrf.mxu2 }
  0xc7   : > { %v1822_v44 = vpop.f32.mrf.mxu3  ;;  %v1824_v45 = vpop.f32.mrf.mxu1 }
  0xca   : > { %v1826_v46 = vpop.f32.mrf.mxu0 }
  0xce   : > { %v1828_v47 = vpop.f32.mrf.mxu2 }
  0xcf   : > { %v1830_v48 = vpop.f32.mrf.mxu3  ;;  %v1832_v49 = vpop.f32.mrf.mxu1 }
  0xd2   : > { %v1834_v50 = vpop.f32.mrf.mxu0 }
  0xd6   : > { %v1836_v51 = vpop.f32.mrf.mxu2 }
  0xd7   : > { %v1838_v52 = vpop.f32.mrf.mxu3  ;;  %v1840_v53 = vpop.f32.mrf.mxu1 }
  0xda   : > { %v1842_v55 = vpop.f32.mrf.mxu0 }
  0xde   : > { %v1844_v57 = vpop.f32.mrf.mxu2 }
  0xdf   : > { %v1846_v59 = vpop.f32.mrf.mxu3  ;;  %v768_v60 = vpop.f32.mrf.mxu1 }
  0xe0   : > { %v792_v1 = vadd.f32 %v768_v60, %v698_v63 }
  0xe2   : > { %v1050_v62 = vpop.f32.mrf.mxu0 }
  0xe6   : > { %v862_v2 = vpop.f32.mrf.mxu2 }
  0xe7   : > { %v886_v4 = vadd.f32 %v862_v2, %v792_v1  ;;  %v956_v5 = vpop.f32.mrf.mxu3  ;;  %v771_v6 = vpop.f32.mrf.mxu1  ;;  %v514_v1 = vadd.f32 %v1820_v43, %v413_v61  ;;  %v416_v43 = vadd.f32 %v1824_v45, %v1810_v23 }
  0xe8   : > { %v793_v14 = vadd.f32 %v771_v6, %v699_v11 }
  0xe9   : > { %v980_v8 = vadd.f32 %v956_v5, %v886_v4  ;;  %v608_v7 = vadd.f32 %v1822_v44, %v514_v1 }
  0xea   : > { %v1053_v10 = vpop.f32.mrf.mxu0 }
  0xeb   : > { %v1074_v13 = vadd.f32 %v1050_v62, %v980_v8 }
  0xed   : > { %1083 = vst.msk [vmem:[%s1853_s22] sm:$0xff] %vm1082_vm2, %v1074_v13  ;;  %v1112_v29 = vmul.f32 %v1074_v13, %v1074_v13  ;;  %v1091_v30 = vsel %vm1082_vm2, %v1074_v13, 0.0  ;;  %v702_v13 = vadd.f32 %v1818_v42, %v608_v7 }
  0xee   : > { %v865_v18 = vpop.f32.mrf.mxu2 }
  0xef   : > { %v887_v20 = vadd.f32 %v865_v18, %v793_v14  ;;  %v959_v9 = vpop.f32.mrf.mxu3  ;;  %v774_v21 = vpop.f32.mrf.mxu1  ;;  %v1120_v17 = vsel %vm1082_vm2, %v1112_v29, 0.0  ;;  %v515_v14 = vadd.f32 %v1828_v47, %v416_v43  ;;  %v419_v47 = vadd.f32 %v1832_v49, %v1798_v16 }
  0xf0   : > { %v794_v32 = vadd.f32 %v774_v21, %v700_v27 }
  0xf1   : > { %v981_v25 = vadd.f32 %v959_v9, %v887_v20  ;;  %v609_v22 = vadd.f32 %v1830_v48, %v515_v14  ;;  %v516_v29 = vadd.f32 %v1836_v51, %v419_v47  ;;  %v422_v51 = vadd.f32 %v1840_v53, %v1812_v24 }
  0xf2   : > { %v1056_v26 = vpop.f32.mrf.mxu0 }
  0xf3   : > { %v1075_v31 = vadd.f32 %v1053_v10, %v981_v25  ;;  %v703_v28 = vadd.f32 %v1826_v46, %v609_v22 }
  0xf5   : > { %1084 = vst.msk [vmem:[%s1853_s22 + $0x8] sm:$0xff] %vm1082_vm2, %v1075_v31  ;;  %v1092_v33 = vsel %vm1082_vm2, %v1075_v31, 0.0  ;;  %v1113_v35 = vmul.f32 %v1075_v31, %v1075_v31 }
  0xf6   : > { %v1093_v36 = vadd.f32 %v1092_v33, %v1091_v30  ;;  %v868_v54 = vpop.f32.mrf.mxu2 }
  0xf7   : > { %v1121_v37 = vsel %vm1082_vm2, %v1113_v35, 0.0  ;;  %v888_v34 = vadd.f32 %v868_v54, %v794_v32  ;;  %v962_v39 = vpop.f32.mrf.mxu3  ;;  %v777_v60 = vpop.f32.mrf.mxu1  ;;  %v610_v54 = vadd.f32 %v1838_v52, %v516_v29 }
  0xf8   : > { %v1122_v58 = vadd.f32 %v1121_v37, %v1120_v17  ;;  %v795_v3 = vadd.f32 %v777_v60, %v701_v0 }
  0xf9   : > { %v982_v62 = vadd.f32 %v962_v39, %v888_v34  ;;  %v704_v34 = vadd.f32 %v1834_v50, %v610_v54  ;;  %v517_v39 = vadd.f32 %v1844_v57, %v422_v51 }
  0xfa   : > { %v1059_v63 = vpop.f32.mrf.mxu0 }
  0xfb   : > { %v1076_v2 = vadd.f32 %v1056_v26, %v982_v62  ;;  %v611_v1 = vadd.f32 %v1846_v59, %v517_v39 }
  0xfd   : > { %1085 = vst.msk [vmem:[%s1853_s22 + $0x10] sm:$0xff] %vm1082_vm2, %v1076_v2  ;;  %v1094_v40 = vsel %vm1082_vm2, %v1076_v2, 0.0  ;;  %v1114_v4 = vmul.f32 %v1076_v2, %v1076_v2 }
  0xfe   : > { %v1095_v5 = vadd.f32 %v1094_v40, %v1093_v36  ;;  %v871_v6 = vpop.f32.mrf.mxu2  ;;  %v705_v40 = vadd.f32 %v1842_v55, %v611_v1 }
  0xff   : > { %v1123_v15 = vsel %vm1082_vm2, %v1114_v4, 0.0  ;;  %v889_v41 = vadd.f32 %v871_v6, %v795_v3  ;;  %v965_v8 = vpop.f32.mrf.mxu3  ;;  %v780_v38 = vpop.f32.mrf.mxu1 }
 0x100   : > { %v1124_v10 = vadd.f32 %v1123_v15, %v1122_v58  ;;  %v796_v19 = vadd.f32 %v780_v38, %v702_v13 }
 0x101   : > { %v983_v11 = vadd.f32 %v965_v8, %v889_v41 }
 0x102   : > { %v1062_v12 = vpop.f32.mrf.mxu0 }
 0x103   : > { %v1077_v18 = vadd.f32 %v1059_v63, %v983_v11 }
 0x105   : > { %1086 = vst.msk [vmem:[%s1853_s22 + $0x18] sm:$0xff] %vm1082_vm2, %v1077_v18  ;;  %v1096_v44 = vsel %vm1082_vm2, %v1077_v18, 0.0  ;;  %v1115_v20 = vmul.f32 %v1077_v18, %v1077_v18 }
 0x106   : > { %v1097_v9 = vadd.f32 %v1096_v44, %v1095_v5  ;;  %v874_v21 = vpop.f32.mrf.mxu2 }
 0x107   : > { %v1125_v23 = vsel %vm1082_vm2, %v1115_v20, 0.0  ;;  %v890_v45 = vadd.f32 %v874_v21, %v796_v19  ;;  %v968_v25 = vpop.f32.mrf.mxu3  ;;  %v783_v42 = vpop.f32.mrf.mxu1 }
 0x108   : > { %v1126_v26 = vadd.f32 %v1125_v23, %v1124_v10  ;;  %v797_v32 = vadd.f32 %v783_v42, %v703_v28 }
 0x109   : > { %v984_v27 = vadd.f32 %v968_v25, %v890_v45 }
 0x10a   : > { %v1065_v30 = vpop.f32.mrf.mxu0 }
 0x10b   : > { %v1078_v31 = vadd.f32 %v1062_v12, %v984_v27 }
 0x10d   : > { %1087 = vst.msk [vmem:[%s1853_s22 + $0x20] sm:$0xff] %vm1082_vm2, %v1078_v31  ;;  %v1098_v48 = vsel %vm1082_vm2, %v1078_v31, 0.0  ;;  %v1116_v33 = vmul.f32 %v1078_v31, %v1078_v31 }
 0x10e   : > { %v1099_v35 = vadd.f32 %v1098_v48, %v1097_v9  ;;  %v877_v36 = vpop.f32.mrf.mxu2 }
 0x10f   : > { %v1127_v16 = vsel %vm1082_vm2, %v1116_v33, 0.0  ;;  %v891_v49 = vadd.f32 %v877_v36, %v797_v32  ;;  %v971_v56 = vpop.f32.mrf.mxu3  ;;  %v786_v17 = vpop.f32.mrf.mxu1 }
 0x110   : > { %v1128_v46 = vadd.f32 %v1127_v16, %v1126_v26  ;;  %v798_v60 = vadd.f32 %v786_v17, %v704_v34 }
 0x111   : > { %v985_v37 = vadd.f32 %v971_v56, %v891_v49 }
 0x112   : > { %v1068_v0 = vpop.f32.mrf.mxu0 }
 0x113   : > { %v1079_v58 = vadd.f32 %v1065_v30, %v985_v37 }
 0x115   : > { %1088 = vst.msk [vmem:[%s1853_s22 + $0x28] sm:$0xff] %vm1082_vm2, %v1079_v58  ;;  %v1100_v52 = vsel %vm1082_vm2, %v1079_v58, 0.0  ;;  %v1117_v61 = vmul.f32 %v1079_v58, %v1079_v58 }
 0x116   : > { %v1101_v62 = vadd.f32 %v1100_v52, %v1099_v35  ;;  %v880_v63 = vpop.f32.mrf.mxu2 }
 0x117   : > { %v1129_v24 = vsel %vm1082_vm2, %v1117_v61, 0.0  ;;  %v892_v53 = vadd.f32 %v880_v63, %v798_v60  ;;  %v974_v2 = vpop.f32.mrf.mxu3  ;;  %v789_v57 = vpop.f32.mrf.mxu1 }
 0x118   : > { %v1130_v50 = vadd.f32 %v1129_v24, %v1128_v46  ;;  %v799_v5 = vadd.f32 %v789_v57, %v705_v40 }
 0x119   : > { %v986_v3 = vadd.f32 %v974_v2, %v892_v53 }
 0x11a   : > { %v1071_v43 = vpop.f32.mrf.mxu0 }
 0x11b   : > { %v1080_v4 = vadd.f32 %v1068_v0, %v986_v3 }
 0x11d   : > { %1089 = vst.msk [vmem:[%s1853_s22 + $0x30] sm:$0xff] %vm1082_vm2, %v1080_v4  ;;  %v1102_v6 = vsel %vm1082_vm2, %v1080_v4, 0.0  ;;  %v1118_v7 = vmul.f32 %v1080_v4, %v1080_v4 }
 0x11e   : > { %v1103_v15 = vadd.f32 %v1102_v6, %v1101_v62  ;;  %v883_v41 = vpop.f32.mrf.mxu2 }
 0x11f   : > { %v1131_v59 = vsel %vm1082_vm2, %v1118_v7, 0.0  ;;  %v893_v8 = vadd.f32 %v883_v41, %v799_v5  ;;  %v977_v10 = vpop.f32.mrf.mxu3 }
 0x120   : > { %v1132_v38 = vadd.f32 %v1131_v59, %v1130_v50 }
 0x121   : > { %v987_v11 = vadd.f32 %v977_v10, %v893_v8 }
 0x123   : > { %v1081_v12 = vadd.f32 %v1071_v43, %v987_v11 }
 0x125   : > { %1090 = vst.msk [vmem:[%s1853_s22 + $0x38] sm:$0xff] %vm1082_vm2, %v1081_v12  ;;  %v1104_v55 = vsel %vm1082_vm2, %v1081_v12, 0.0  ;;  %v1119_v13 = vmul.f32 %v1081_v12, %v1081_v12 }
 0x126   : > { %v1105_v14 = vadd.f32 %v1104_v55, %v1103_v15 }
 0x127   : > { %v1133_v18 = vsel %vm1082_vm2, %v1119_v13, 0.0 }
 0x128   : > { %v1106_v19 = vrot.slane %v1105_v14, 4  ;;  %v1134_v44 = vadd.f32 %v1133_v18, %v1132_v38 }
 0x12a   : > { %v1107_v20 = vadd.f32 %v1106_v19, %v1105_v14  ;;  %v1135_v9 = vrot.slane %v1134_v44, 4 }
 0x12c   : > { %v1108_v21 = vrot.slane %v1107_v20, 2  ;;  %v1136_v22 = vadd.f32 %v1135_v9, %v1134_v44 }
 0x12e   : > { %v1109_v23 = vadd.f32 %v1108_v21, %v1107_v20  ;;  %v1137_v45 = vrot.slane %v1136_v22, 2 }
 0x130   : > { %v1110_v25 = vrot.slane %v1109_v23, 1  ;;  %v1138_v26 = vadd.f32 %v1137_v45, %v1136_v22 }
 0x132   : > { %v1111_v42 = vadd.f32 %v1110_v25, %v1109_v23  ;;  %v1139_v47 = vrot.slane %v1138_v26, 1 }
 0x134   : > { %v1140_v27 = vadd.f32 %v1139_v47, %v1138_v26  ;;  %1146 = vst.msk [vmem:[%s248_s25] sm:$0x1] %vm1145_vm3, %v1111_v42 }
 0x136   : > { %1147 = vst.msk [vmem:[%s251_s28] sm:$0x1] %vm1145_vm3, %v1140_v27 }
 0x137 PF: > { %s15_s17 = sadd.s32 1, %s1566_s17   ;;  %s1931_s15 = smov %s1562_s16 }
 0x138   : > { %p12_p5 = scmp.ge.s32.totalorder %s15_s17, 4   ;;  %s1932_s16 = smov %s1934_s18 }
 0x13a   :  { %14 = sbr.rel (!%p12_p5) target bundleno = 2 (0x2), region = 169 }

// kernel: pyramid_block.23
= control target key start
LH: loop header
LB: loop body
LE: loop exit
PB: predicated region body
PF: predicated region fallthrough
CT: control target
= control target key end

     0   :  { %s588_s15 = smov 0   ;;  %s590_s16 = smov 0   ;;  %s653_s0 = inlined_call_operand.vmem [shape: f32[2,64,8], index: 0, kind: input, shape index: {}]   ;;  %s654_s1 = inlined_call_operand.vmem [shape: f32[2,1,8], index: 1, kind: input, shape index: {}]   ;;  %s655_s2 = inlined_call_operand.vmem [shape: f32[2,1,8], index: 2, kind: input, shape index: {}]   ;;  %s656_s3 = inlined_call_operand.vmem [shape: f32[2,64,8], index: 3, kind: input, shape index: {}]   ;;  %s657_s4 = inlined_call_operand.vmem [shape: f32[2,64,8], index: 4, kind: output, shape index: {}]  }
   0x1   :  { %s592_s17 = smov 0  }
   0x2 LB: > { %s26_s18 = sadd.s32 1, %s557_s16  ;;  %p501_p0 = scmp.ge.s32.totalorder %s561_s17, 1  ;;  %s561_s17 = sphi %s592_s17, %s14_s17   ;;  %s557_s16 = sphi %s590_s16, %s659_s16   ;;  %s553_s15 = sphi %s588_s15, %s658_s15  }
   0x3   : > { %p28_p1 = scmp.ge.s32.totalorder %s26_s18, 2  ;;  %p216_p2 = scmp.lt.s32.totalorder %s561_s17, 3 }
   0x5   : > { %s661_s18 = smov (%p28_p1, %s26_s18), 0  ;;  %p217_p3 = pnand %p501_p0, %p216_p2 }
   0x6   : > { %p266_p4 = scmp.lt.s32.totalorder (!%p217_p3), %s553_s15, 1 }
   0x7   : > { %220 = sbr.rel (%p217_p3) target bundleno = 57 (0x39), region = 36 }
   0xc   : > { %s663_s15 = smov (!%p266_p4, %s553_s15), 1  ;;  %vm365_vm3 = vcmask 64512  }
   0xd   : > { %s277_s21 = scalar_lea.vmem %s654_s1, %s663_s15  ;;  %s280_s24 = scalar_lea.vmem %s655_s2, %s663_s15 }
   0xe   : > { %v309_v0 = vld [vmem:[%s277_s21] sm:$0x1]  ;;  %s612_s25 = sshll.u32 %s663_s15, 6 }
   0xf   : > { %v310_v1 = vmul.f32 0.015625, %v309_v0  ;;  %v311_v2 = vld [vmem:[%s280_s24] sm:$0x1]  ;;  %s273_s28 = scalar_lea.vmem %s653_s0, %s612_s25  ;;  %s622_s5 = scalar_lea.vmem %s656_s3, %s612_s25 }
  0x10   : > { %v312_v3 = vmul.f32 0.015625, %v311_v2  ;;  %v301_v12 = vld [vmem:[%s273_s28] sm:$0xff]  ;;  %v302_v15 = vld [vmem:[%s273_s28 + $0x8] sm:$0xff]  ;;  %v303_v16 = vld [vmem:[%s273_s28 + $0x10] sm:$0xff]  ;;  %s299_s8 = scalar_lea.vmem %s657_s4, %s612_s25 }
  0x11   : > { %v313_v4 = vmul.f32 %v310_v1, %v310_v1  ;;  %v328_v13 = vperm.slane %v310_v1, 0  ;;  %v304_v17 = vld [vmem:[%s273_s28 + $0x18] sm:$0xff]  ;;  %v305_v18 = vld [vmem:[%s273_s28 + $0x20] sm:$0xff]  ;;  %v306_v19 = vld [vmem:[%s273_s28 + $0x28] sm:$0xff] }
  0x12   : > { %v307_v21 = vld [vmem:[%s273_s28 + $0x30] sm:$0xff]  ;;  %v308_v26 = vld [vmem:[%s273_s28 + $0x38] sm:$0xff]  ;;  %v349_v32 = vld [vmem:[%s622_s5] sm:$0xff] }
  0x13   : > { %v314_v5 = vsub.f32 %v312_v3, %v313_v4  ;;  %v330_v22 = vsub.f32 %v301_v12, %v328_v13  ;;  %v331_v23 = vsub.f32 %v302_v15, %v328_v13  ;;  %v332_v24 = vsub.f32 %v303_v16, %v328_v13  ;;  %v350_v33 = vld [vmem:[%s622_s5 + $0x8] sm:$0xff]  ;;  %v351_v34 = vld [vmem:[%s622_s5 + $0x10] sm:$0xff]  ;;  %v352_v40 = vld [vmem:[%s622_s5 + $0x18] sm:$0xff] }
  0x14   : > { %v333_v25 = vsub.f32 %v304_v17, %v328_v13  ;;  %v334_v28 = vsub.f32 %v305_v18, %v328_v13  ;;  %v335_v29 = vsub.f32 %v306_v19, %v328_v13  ;;  %v336_v31 = vsub.f32 %v307_v21, %v328_v13  ;;  %v353_v42 = vld [vmem:[%s622_s5 + $0x20] sm:$0xff]  ;;  %v354_v47 = vld [vmem:[%s622_s5 + $0x28] sm:$0xff]  ;;  %v355_v50 = vld [vmem:[%s622_s5 + $0x30] sm:$0xff] }
  0x15   : > { %v315_v6 = vmax.f32 %v314_v5, 0.0  ;;  %v337_v35 = vsub.f32 %v308_v26, %v328_v13  ;;  %v356_v53 = vld [vmem:[%s622_s5 + $0x38] sm:$0xff] }
  0x17   : > { %v316_v7 = vadd.f32 1e-05, %v315_v6 }
  0x19   : > { %537 = vrsqrt.f32 %v316_v7  ;;  %vm323_vm0 = vweird.f32 %v316_v7 }
  0x1f   : > { %v538_v8 = vpop.eup %537 }
  0x20   : > { %v318_v9 = vmul.f32 %v538_v8, %v316_v7  ;;  %vm324_vm1 = vweird.f32 %v538_v8 }
  0x21   : > { %vm325_vm2 = vmor %vm323_vm0, %vm324_vm1 }
  0x22   : > { %v319_v10 = vmul.f32 %v538_v8, %v318_v9 }
  0x24   : > { %v320_v11 = vmul.f32 0.5, %v319_v10 }
  0x26   : > { %v321_v14 = vsub.f32 1.5, %v320_v11 }
  0x28   : > { %v322_v20 = vmul.f32 %v538_v8, %v321_v14 }
  0x2a   : > { %v326_v27 = vsel %vm325_vm2, %v538_v8, %v322_v20 }
  0x2b   : > { %v339_v30 = vperm.slane %v326_v27, 0 }
  0x2d   : > { %v341_v36 = vmul.f32 %v339_v30, %v330_v22  ;;  %v342_v37 = vmul.f32 %v339_v30, %v331_v23  ;;  %v343_v38 = vmul.f32 %v339_v30, %v332_v24  ;;  %v344_v39 = vmul.f32 %v339_v30, %v333_v25 }
  0x2e   : > { %v345_v41 = vmul.f32 %v339_v30, %v334_v28  ;;  %v346_v43 = vmul.f32 %v339_v30, %v335_v29  ;;  %v347_v48 = vmul.f32 %v339_v30, %v336_v31  ;;  %v348_v51 = vmul.f32 %v339_v30, %v337_v35 }
  0x2f   : > { %v357_v44 = vadd.f32 %v349_v32, %v341_v36  ;;  %v358_v45 = vadd.f32 %v350_v33, %v342_v37  ;;  %v359_v46 = vadd.f32 %v351_v34, %v343_v38  ;;  %v360_v49 = vadd.f32 %v352_v40, %v344_v39 }
  0x30   : > { %v361_v52 = vadd.f32 %v353_v42, %v345_v41  ;;  %v362_v54 = vadd.f32 %v354_v47, %v346_v43  ;;  %v363_v55 = vadd.f32 %v355_v50, %v347_v48  ;;  %v364_v56 = vadd.f32 %v356_v53, %v348_v51 }
  0x31   : > { %366 = vst.msk [vmem:[%s299_s8] sm:$0xff] %vm365_vm3, %v357_v44 }
  0x32   : > { %367 = vst.msk [vmem:[%s299_s8 + $0x8] sm:$0xff] %vm365_vm3, %v358_v45 }
  0x33   : > { %368 = vst.msk [vmem:[%s299_s8 + $0x10] sm:$0xff] %vm365_vm3, %v359_v46 }
  0x34   : > { %369 = vst.msk [vmem:[%s299_s8 + $0x18] sm:$0xff] %vm365_vm3, %v360_v49 }
  0x35   : > { %370 = vst.msk [vmem:[%s299_s8 + $0x20] sm:$0xff] %vm365_vm3, %v361_v52 }
  0x36   : > { %371 = vst.msk [vmem:[%s299_s8 + $0x28] sm:$0xff] %vm365_vm3, %v362_v54 }
  0x37   : > { %372 = vst.msk [vmem:[%s299_s8 + $0x30] sm:$0xff] %vm365_vm3, %v363_v55 }
  0x38   : > { %373 = vst.msk [vmem:[%s299_s8 + $0x38] sm:$0xff] %vm365_vm3, %v364_v56 }
  0x39 PF: > { %s14_s17 = sadd.s32 1, %s561_s17   ;;  %s658_s15 = smov %s557_s16 }
  0x3a   : > { %p11_p5 = scmp.ge.s32.totalorder %s14_s17, 4   ;;  %s659_s16 = smov %s661_s18 }
  0x3c   :  { %13 = sbr.rel (!%p11_p5) target bundleno = 2 (0x2), region = 75 }

// kernel: pyramid_block.21
= control target key start
LH: loop header
LB: loop body
LE: loop exit
PB: predicated region body
PF: predicated region fallthrough
CT: control target
= control target key end

     0   :  { %s491_s12 = smov 0   ;;  %s493_s13 = smov 0   ;;  %s547_s0 = inlined_call_operand.vmem [shape: f32[2,64,8], index: 0, kind: input, shape index: {}]   ;;  %s548_s1 = inlined_call_operand.vmem [shape: f32[2,1,8], index: 1, kind: input, shape index: {}]   ;;  %s549_s2 = inlined_call_operand.vmem [shape: f32[2,1,8], index: 2, kind: input, shape index: {}]   ;;  %s550_s3 = inlined_call_operand.vmem [shape: f32[2,64,8], index: 3, kind: output, shape index: {}]  }
   0x1   :  { %s495_s14 = smov 0  }
   0x2 LB: > { %s25_s15 = sadd.s32 1, %s465_s13  ;;  %p412_p0 = scmp.ge.s32.totalorder %s469_s14, 1  ;;  %s469_s14 = sphi %s495_s14, %s13_s14   ;;  %s465_s13 = sphi %s493_s13, %s552_s13   ;;  %s461_s12 = sphi %s491_s12, %s551_s12  }
   0x3   : > { %p27_p1 = scmp.ge.s32.totalorder %s25_s15, 2  ;;  %p174_p2 = scmp.lt.s32.totalorder %s469_s14, 3 }
   0x5   : > { %s554_s15 = smov (%p27_p1, %s25_s15), 0  ;;  %p175_p3 = pnand %p412_p0, %p174_p2 }
   0x6   : > { %p213_p4 = scmp.lt.s32.totalorder (!%p175_p3), %s461_s12, 1 }
   0x7   : > { %178 = sbr.rel (%p175_p3) target bundleno = 57 (0x39), region = 32 }
   0xc   : > { %s556_s12 = smov (!%p213_p4, %s461_s12), 1  ;;  %vm294_vm3 = vcmask 64512  }
   0xd   : > { %s224_s18 = scalar_lea.vmem %s548_s1, %s556_s12  ;;  %s227_s21 = scalar_lea.vmem %s549_s2, %s556_s12 }
   0xe   : > { %v246_v0 = vld [vmem:[%s224_s18] sm:$0x1]  ;;  %s419_s22 = sshll.u32 %s556_s12, 6 }
   0xf   : > { %v247_v1 = vmul.f32 0.015625, %v246_v0  ;;  %v248_v2 = vld [vmem:[%s227_s21] sm:$0x1]  ;;  %s220_s25 = scalar_lea.vmem %s547_s0, %s419_s22  ;;  %s236_s28 = scalar_lea.vmem %s550_s3, %s419_s22 }
  0x10   : > { %v249_v3 = vmul.f32 0.015625, %v248_v2  ;;  %v238_v12 = vld [vmem:[%s220_s25] sm:$0xff]  ;;  %v239_v15 = vld [vmem:[%s220_s25 + $0x8] sm:$0xff]  ;;  %v240_v16 = vld [vmem:[%s220_s25 + $0x10] sm:$0xff] }
  0x11   : > { %v250_v4 = vmul.f32 %v247_v1, %v247_v1  ;;  %v265_v13 = vperm.slane %v247_v1, 0  ;;  %v241_v17 = vld [vmem:[%s220_s25 + $0x18] sm:$0xff]  ;;  %v242_v18 = vld [vmem:[%s220_s25 + $0x20] sm:$0xff]  ;;  %v243_v19 = vld [vmem:[%s220_s25 + $0x28] sm:$0xff] }
  0x12   : > { %v244_v21 = vld [vmem:[%s220_s25 + $0x30] sm:$0xff]  ;;  %v245_v26 = vld [vmem:[%s220_s25 + $0x38] sm:$0xff] }
  0x13   : > { %v251_v5 = vsub.f32 %v249_v3, %v250_v4  ;;  %v267_v22 = vsub.f32 %v238_v12, %v265_v13  ;;  %v268_v23 = vsub.f32 %v239_v15, %v265_v13  ;;  %v269_v24 = vsub.f32 %v240_v16, %v265_v13 }
  0x14   : > { %v270_v25 = vsub.f32 %v241_v17, %v265_v13  ;;  %v271_v28 = vsub.f32 %v242_v18, %v265_v13  ;;  %v272_v29 = vsub.f32 %v243_v19, %v265_v13  ;;  %v273_v31 = vsub.f32 %v244_v21, %v265_v13 }
  0x15   : > { %v252_v6 = vmax.f32 %v251_v5, 0.0  ;;  %v274_v32 = vsub.f32 %v245_v26, %v265_v13 }
  0x17   : > { %v253_v7 = vadd.f32 1e-05, %v252_v6 }
  0x19   : > { %445 = vrsqrt.f32 %v253_v7  ;;  %vm260_vm0 = vweird.f32 %v253_v7 }
  0x1f   : > { %v446_v8 = vpop.eup %445 }
  0x20   : > { %v255_v9 = vmul.f32 %v446_v8, %v253_v7  ;;  %vm261_vm1 = vweird.f32 %v446_v8 }
  0x21   : > { %vm262_vm2 = vmor %vm260_vm0, %vm261_vm1 }
  0x22   : > { %v256_v10 = vmul.f32 %v446_v8, %v255_v9 }
  0x24   : > { %v257_v11 = vmul.f32 0.5, %v256_v10 }
  0x26   : > { %v258_v14 = vsub.f32 1.5, %v257_v11 }
  0x28   : > { %v259_v20 = vmul.f32 %v446_v8, %v258_v14 }
  0x2a   : > { %v263_v27 = vsel %vm262_vm2, %v446_v8, %v259_v20 }
  0x2b   : > { %v276_v30 = vperm.slane %v263_v27, 0 }
  0x2d   : > { %v278_v33 = vmul.f32 %v276_v30, %v267_v22  ;;  %v279_v34 = vmul.f32 %v276_v30, %v268_v23  ;;  %v280_v35 = vmul.f32 %v276_v30, %v269_v24  ;;  %v281_v36 = vmul.f32 %v276_v30, %v270_v25 }
  0x2e   : > { %v282_v37 = vmul.f32 %v276_v30, %v271_v28  ;;  %v283_v38 = vmul.f32 %v276_v30, %v272_v29  ;;  %v284_v42 = vmul.f32 %v276_v30, %v273_v31  ;;  %v285_v44 = vmul.f32 %v276_v30, %v274_v32 }
  0x2f   : > { %v286_v39 = vmax.f32 %v278_v33, 0.0  ;;  %v287_v40 = vmax.f32 %v279_v34, 0.0  ;;  %v288_v41 = vmax.f32 %v280_v35, 0.0  ;;  %v289_v43 = vmax.f32 %v281_v36, 0.0 }
  0x30   : > { %v290_v45 = vmax.f32 %v282_v37, 0.0  ;;  %v291_v46 = vmax.f32 %v283_v38, 0.0  ;;  %v292_v47 = vmax.f32 %v284_v42, 0.0  ;;  %v293_v48 = vmax.f32 %v285_v44, 0.0 }
  0x31   : > { %295 = vst.msk [vmem:[%s236_s28] sm:$0xff] %vm294_vm3, %v286_v39 }
  0x32   : > { %296 = vst.msk [vmem:[%s236_s28 + $0x8] sm:$0xff] %vm294_vm3, %v287_v40 }
  0x33   : > { %297 = vst.msk [vmem:[%s236_s28 + $0x10] sm:$0xff] %vm294_vm3, %v288_v41 }
  0x34   : > { %298 = vst.msk [vmem:[%s236_s28 + $0x18] sm:$0xff] %vm294_vm3, %v289_v43 }
  0x35   : > { %299 = vst.msk [vmem:[%s236_s28 + $0x20] sm:$0xff] %vm294_vm3, %v290_v45 }
  0x36   : > { %300 = vst.msk [vmem:[%s236_s28 + $0x28] sm:$0xff] %vm294_vm3, %v291_v46 }
  0x37   : > { %301 = vst.msk [vmem:[%s236_s28 + $0x30] sm:$0xff] %vm294_vm3, %v292_v47 }
  0x38   : > { %302 = vst.msk [vmem:[%s236_s28 + $0x38] sm:$0xff] %vm294_vm3, %v293_v48 }
  0x39 PF: > { %s13_s14 = sadd.s32 1, %s469_s14   ;;  %s551_s12 = smov %s465_s13 }
  0x3a   : > { %p10_p5 = scmp.ge.s32.totalorder %s13_s14, 4   ;;  %s552_s13 = smov %s554_s15 }
  0x3c   :  { %12 = sbr.rel (!%p10_p5) target bundleno = 2 (0x2), region = 68 }

// kernel: pyramid_block.20
= control target key start
LH: loop header
LB: loop body
LE: loop exit
PB: predicated region body
PF: predicated region fallthrough
CT: control target
= control target key end

     0   :  { %s1417_s15 = smov 0   ;;  %s1419_s16 = smov 0   ;;  %s1726_s0 = inlined_call_operand.vmem [shape: f32[2,1,10,10,8], index: 0, kind: input, shape index: {}]   ;;  %s1727_s1 = inlined_call_operand.vmem [shape: f32[9,8,8], index: 1, kind: input, shape index: {}]   ;;  %s1728_s2 = inlined_call_operand.vmem [shape: f32[2,64,8], index: 2, kind: output, shape index: {0}]   ;;  %s1729_s3 = inlined_call_operand.vmem [shape: f32[2,1,8], index: 3, kind: output, shape index: {1}]   ;;  %s1730_s4 = inlined_call_operand.vmem [shape: f32[2,1,8], index: 4, kind: output, shape index: {2}]  }
   0x1   :  { %s1421_s17 = smov 0  }
   0x2 LB: > { %s27_s18 = sadd.s32 1, %s1386_s16  ;;  %p1205_p0 = scmp.ge.s32.totalorder %s1390_s17, 1  ;;  %s1390_s17 = sphi %s1421_s17, %s15_s17   ;;  %s1386_s16 = sphi %s1419_s16, %s1732_s16   ;;  %s1382_s15 = sphi %s1417_s15, %s1731_s15  }
   0x3   : > { %p29_p1 = scmp.ge.s32.totalorder %s27_s18, 2  ;;  %p187_p2 = scmp.lt.s32.totalorder %s1390_s17, 3 }
   0x5   : > { %s1734_s18 = smov (%p29_p1, %s27_s18), 0  ;;  %p188_p3 = pnand %p1205_p0, %p187_p2 }
   0x6   : > { %p227_p4 = scmp.lt.s32.totalorder (!%p188_p3), %s1382_s15, 1 }
   0x7   : > { %191 = sbr.rel (%p188_p3) target bundleno = 310 (0x136), region = 28 }
   0xc   : > { %v1209_v0 = vld [vmem:[%s1727_s1 + $0x8] sm:$0xff]  ;;  %v1226_v1 = vld [vmem:[%s1727_s1 + $0x10] sm:$0xff]  ;;  %v1243_v2 = vld [vmem:[%s1727_s1 + $0x18] sm:$0xff]  ;;  %s1736_s15 = smov (!%p227_p4, %s1382_s15), 1  ;;  %vm271_vm0 = vcmask 64512   ;;  %vm1047_vm1 = vcmask 57344  }
   0xd   : > { %1340 = vmatpush.msra.mxu1 %v1209_v0  ;;  %1341 = vmatpush.msra.mxu2 %v1209_v0  ;;  %v260_v3 = vld [vmem:[%s1727_s1] sm:$0xff]  ;;  %s1343_s29 = smul.u32 160, %s1736_s15  ;;  %v1294_v5 = vld [vmem:[%s1727_s1 + $0x30] sm:$0xff]  ;;  %v1311_v6 = vld [vmem:[%s1727_s1 + $0x38] sm:$0xff]  ;;  %s1339_s19 = sshll.u32 %s1736_s15, 6 }
   0xe   : > { %1342 = vmatpush.msra.mxu3 %v1209_v0  ;;  %v1260_v4 = vld [vmem:[%s1727_s1 + $0x20] sm:$0xff]  ;;  %311 = vmatpush.msra.mxu0 %v1209_v0  ;;  %v1277_v11 = vld [vmem:[%s1727_s1 + $0x28] sm:$0xff]  ;;  %s1653_s22 = scalar_lea.vmem %s1728_s2, %s1339_s19  ;;  %s248_s25 = scalar_lea.vmem %s1729_s3, %s1736_s15 }
   0xf   : > { %451 = vmatpush.msrb.mxu2 %v1226_v1  ;;  %376 = vmatpush.msrb.mxu1 %v260_v3  ;;  %s1456_s6 = scalar_lea.vmem %s1726_s0, %s1343_s29  ;;  %v1328_v12 = vld [vmem:[%s1727_s1 + $0x40] sm:$0xff]  ;;  %s251_s28 = scalar_lea.vmem %s1730_s4, %s1736_s15 }
  0x10   : > { %535 = vmatpush.msrb.mxu3 %v1243_v2  ;;  %618 = vmatpush.msrb.mxu0 %v1260_v4  ;;  %v1465_v7 = vld [vmem:[%s1456_s6 + $0x21] sm:$0xff]  ;;  %v1488_v13 = vld [vmem:[%s1456_s6 + $0x31] sm:$0xff] }
  0x11   : > { %v1468_v8 = vld [vmem:[%s1456_s6 + $0x41] sm:$0xff]  ;;  %1212 = vmatmul.msk.f32.vlgmr.msra.gmra.mxu1 %vm271_vm0, %v1465_v7  ;;  %v1491_v14 = vld [vmem:[%s1456_s6 + $0x51] sm:$0xff] }
  0x12   : > { %v1471_v9 = vld [vmem:[%s1456_s6 + $0x61] sm:$0xff]  ;;  %1214 = vmatmul.msk.f32.vlgmr.msra.gmra.mxu2 %vm271_vm0, %v1468_v8  ;;  %701 = vmatpush.msra.mxu1 %v1277_v11  ;;  %v1494_v15 = vld [vmem:[%s1456_s6 + $0x71] sm:$0xff] }
  0x13   : > { %v261_v10 = vld [vmem:[%s1456_s6 + $0x1] sm:$0xff]  ;;  %1216 = vmatmul.msk.f32.vlgmr.msra.gmra.mxu3 %vm271_vm0, %v1471_v9  ;;  %785 = vmatpush.msra.mxu2 %v1294_v5  ;;  %v262_v16 = vld [vmem:[%s1456_s6 + $0x11] sm:$0xff] }
  0x14   : > { %1210 = vmatmul.msk.f32.vlgmr.msra.gmra.mxu0 %vm271_vm0, %v261_v10  ;;  %868 = vmatpush.msra.mxu3 %v1311_v6  ;;  %v252_v17 = vld [vmem:[%s1456_s6] sm:$0xff]  ;;  %v1235_v19 = vld [vmem:[%s1456_s6 + $0x10] sm:$0xff] }
  0x15   : > { %951 = vmatpush.msra.mxu0 %v1328_v12  ;;  %v402_v18 = vld [vmem:[%s1456_s6 + $0x2] sm:$0xff]  ;;  %v403_v20 = vld [vmem:[%s1456_s6 + $0x12] sm:$0xff] }
  0x16   : > { %v1236_v21 = vld [vmem:[%s1456_s6 + $0x20] sm:$0xff]  ;;  %v1237_v23 = vld [vmem:[%s1456_s6 + $0x30] sm:$0xff] }
  0x17   : > { %v404_v22 = vld [vmem:[%s1456_s6 + $0x22] sm:$0xff]  ;;  %v405_v24 = vld [vmem:[%s1456_s6 + $0x32] sm:$0xff] }
  0x18   : > { %v1238_v25 = vld [vmem:[%s1456_s6 + $0x40] sm:$0xff]  ;;  %v1239_v27 = vld [vmem:[%s1456_s6 + $0x50] sm:$0xff] }
  0x19   : > { %1213 = vmatmul.msk.f32.gmra.mxu1 %vm271_vm0, %v1488_v13  ;;  %v406_v26 = vld [vmem:[%s1456_s6 + $0x42] sm:$0xff]  ;;  %v407_v28 = vld [vmem:[%s1456_s6 + $0x52] sm:$0xff] }
  0x1a   : > { %1215 = vmatmul.msk.f32.gmra.mxu2 %vm271_vm0, %v1491_v14  ;;  %v1240_v29 = vld [vmem:[%s1456_s6 + $0x60] sm:$0xff]  ;;  %v1241_v31 = vld [vmem:[%s1456_s6 + $0x70] sm:$0xff] }
  0x1b   : > { %1217 = vmatmul.msk.f32.gmra.mxu3 %vm271_vm0, %v1494_v15  ;;  %v408_v30 = vld [vmem:[%s1456_s6 + $0x62] sm:$0xff]  ;;  %v409_v32 = vld [vmem:[%s1456_s6 + $0x72] sm:$0xff] }
  0x1c   : > { %1211 = vmatmul.msk.f32.gmra.mxu0 %vm271_vm0, %v262_v16  ;;  %v1242_v33 = vld [vmem:[%s1456_s6 + $0x80] sm:$0xff]  ;;  %v1293_v41 = vld [vmem:[%s1456_s6 + $0x90] sm:$0xff] }
  0x1d   : > { %v1259_v34 = vld [vmem:[%s1456_s6 + $0x81] sm:$0xff]  ;;  %v1310_v42 = vld [vmem:[%s1456_s6 + $0x91] sm:$0xff] }
  0x1e   : > { %v1276_v37 = vld [vmem:[%s1456_s6 + $0x82] sm:$0xff]  ;;  %v1327_v44 = vld [vmem:[%s1456_s6 + $0x92] sm:$0xff] }
  0x21   : > { %1218 = vmatmul.msk.f32.vlgmr.msrb.gmra.mxu1 %vm271_vm0, %v252_v17 }
  0x22   : > { %1227 = vmatmul.msk.f32.vlgmr.msrb.gmra.mxu2 %vm271_vm0, %v402_v18 }
  0x23   : > { %1244 = vmatmul.msk.f32.vlgmr.msrb.gmra.mxu3 %vm271_vm0, %v1235_v19 }
  0x24   : > { %1261 = vmatmul.msk.f32.vlgmr.msrb.gmra.mxu0 %vm271_vm0, %v262_v16 }
  0x29   : > { %1219 = vmatmul.msk.f32.gmra.mxu1 %vm271_vm0, %v1235_v19 }
  0x2a   : > { %1228 = vmatmul.msk.f32.gmra.mxu2 %vm271_vm0, %v403_v20 }
  0x2b   : > { %1245 = vmatmul.msk.f32.gmra.mxu3 %vm271_vm0, %v1236_v21 }
  0x2c   : > { %1262 = vmatmul.msk.f32.gmra.mxu0 %vm271_vm0, %v1465_v7 }
  0x31   : > { %1220 = vmatmul.msk.f32.gmra.mxu1 %vm271_vm0, %v1236_v21 }
  0x32   : > { %1229 = vmatmul.msk.f32.gmra.mxu2 %vm271_vm0, %v404_v22 }
  0x33   : > { %1246 = vmatmul.msk.f32.gmra.mxu3 %vm271_vm0, %v1237_v23 }
  0x34   : > { %1263 = vmatmul.msk.f32.gmra.mxu0 %vm271_vm0, %v1488_v13 }
  0x39   : > { %1221 = vmatmul.msk.f32.gmra.mxu1 %vm271_vm0, %v1237_v23 }
  0x3a   : > { %1230 = vmatmul.msk.f32.gmra.mxu2 %vm271_vm0, %v405_v24 }
  0x3b   : > { %1247 = vmatmul.msk.f32.gmra.mxu3 %vm271_vm0, %v1238_v25 }
  0x3c   : > { %1264 = vmatmul.msk.f32.gmra.mxu0 %vm271_vm0, %v1468_v8 }
  0x41   : > { %1222 = vmatmul.msk.f32.gmra.mxu1 %vm271_vm0, %v1238_v25 }
  0x42   : > { %1231 = vmatmul.msk.f32.gmra.mxu2 %vm271_vm0, %v406_v26 }
  0x43   : > { %1248 = vmatmul.msk.f32.gmra.mxu3 %vm271_vm0, %v1239_v27 }
  0x44   : > { %1265 = vmatmul.msk.f32.gmra.mxu0 %vm271_vm0, %v1491_v14 }
  0x49   : > { %1223 = vmatmul.msk.f32.gmra.mxu1 %vm271_vm0, %v1239_v27 }
  0x4a   : > { %1232 = vmatmul.msk.f32.gmra.mxu2 %vm271_vm0, %v407_v28 }
  0x4b   : > { %1249 = vmatmul.msk.f32.gmra.mxu3 %vm271_vm0, %v1240_v29 }
  0x4c   : > { %1266 = vmatmul.msk.f32.gmra.mxu0 %vm271_vm0, %v1471_v9 }
  0x51   : > { %1224 = vmatmul.msk.f32.gmra.mxu1 %vm271_vm0, %v1240_v29 }
  0x52   : > { %1233 = vmatmul.msk.f32.gmra.mxu2 %vm271_vm0, %v408_v30 }
  0x53   : > { %1250 = vmatmul.msk.f32.gmra.mxu3 %vm271_vm0, %v1241_v31 }
  0x54   : > { %1267 = vmatmul.msk.f32.gmra.mxu0 %vm271_vm0, %v1494_v15 }
  0x59   : > { %1225 = vmatmul.msk.f32.gmra.mxu1 %vm271_vm0, %v1241_v31 }
  0x5a   : > { %1234 = vmatmul.msk.f32.gmra.mxu2 %vm271_vm0, %v409_v32 }
  0x5b   : > { %1251 = vmatmul.msk.f32.gmra.mxu3 %vm271_vm0, %v1242_v33 }
  0x5c   : > { %1268 = vmatmul.msk.f32.gmra.mxu0 %vm271_vm0, %v1259_v34 }
  0x61   : > { %1278 = vmatmul.msk.f32.vlgmr.msra.gmra.mxu1 %vm271_vm0, %v403_v20 }
  0x62   : > { %1295 = vmatmul.msk.f32.vlgmr.msra.gmra.mxu2 %vm271_vm0, %v1236_v21 }
  0x63   : > { %1312 = vmatmul.msk.f32.vlgmr.msra.gmra.mxu3 %vm271_vm0, %v1465_v7 }
  0x64   : > { %1329 = vmatmul.msk.f32.vlgmr.msra.gmra.mxu0 %vm271_vm0, %v404_v22 }
  0x69   : > { %1279 = vmatmul.msk.f32.gmra.mxu1 %vm271_vm0, %v404_v22 }
  0x6a   : > { %1296 = vmatmul.msk.f32.gmra.mxu2 %vm271_vm0, %v1237_v23 }
  0x6b   : > { %1313 = vmatmul.msk.f32.gmra.mxu3 %vm271_vm0, %v1488_v13 }
  0x6c   : > { %1330 = vmatmul.msk.f32.gmra.mxu0 %vm271_vm0, %v405_v24 }
  0x71   : > { %1280 = vmatmul.msk.f32.gmra.mxu1 %vm271_vm0, %v405_v24 }
  0x72   : > { %1297 = vmatmul.msk.f32.gmra.mxu2 %vm271_vm0, %v1238_v25 }
  0x73   : > { %1314 = vmatmul.msk.f32.gmra.mxu3 %vm271_vm0, %v1468_v8 }
  0x74   : > { %1331 = vmatmul.msk.f32.gmra.mxu0 %vm271_vm0, %v406_v26 }
  0x79   : > { %1281 = vmatmul.msk.f32.gmra.mxu1 %vm271_vm0, %v406_v26 }
  0x7a   : > { %1298 = vmatmul.msk.f32.gmra.mxu2 %vm271_vm0, %v1239_v27 }
  0x7b   : > { %1315 = vmatmul.msk.f32.gmra.mxu3 %vm271_vm0, %v1491_v14 }
  0x7c   : > { %1332 = vmatmul.msk.f32.gmra.mxu0 %vm271_vm0, %v407_v28 }
  0x81   : > { %1282 = vmatmul.msk.f32.gmra.mxu1 %vm271_vm0, %v407_v28 }
  0x82   : > { %1299 = vmatmul.msk.f32.gmra.mxu2 %vm271_vm0, %v1240_v29 }
  0x83   : > { %1316 = vmatmul.msk.f32.gmra.mxu3 %vm271_vm0, %v1471_v9 }
  0x84   : > { %1333 = vmatmul.msk.f32.gmra.mxu0 %vm271_vm0, %v408_v30 }
  0x89   : > { %1283 = vmatmul.msk.f32.gmra.mxu1 %vm271_vm0, %v408_v30 }
  0x8a   : > { %1300 = vmatmul.msk.f32.gmra.mxu2 %vm271_vm0, %v1241_v31 }
  0x8b   : > { %1317 = vmatmul.msk.f32.gmra.mxu3 %vm271_vm0, %v1494_v15 }
  0x8c   : > { %1334 = vmatmul.msk.f32.gmra.mxu0 %vm271_vm0, %v409_v32 }
  0x8e   : > { %v1590_v35 = vpop.f32.mrf.mxu1 }
  0x91   : > { %v313_v36 = vpop.f32.mrf.mxu0  ;;  %1284 = vmatmul.msk.f32.gmra.mxu1 %vm271_vm0, %v409_v32 }
  0x92   : > { %1301 = vmatmul.msk.f32.gmra.mxu2 %vm271_vm0, %v1242_v33 }
  0x93   : > { %1318 = vmatmul.msk.f32.gmra.mxu3 %vm271_vm0, %v1259_v34 }
  0x94   : > { %1335 = vmatmul.msk.f32.gmra.mxu0 %vm271_vm0, %v1276_v37 }
  0x95   : > { %v1597_v38 = vpop.f32.mrf.mxu2 }
  0x96   : > { %v1599_v39 = vpop.f32.mrf.mxu3  ;;  %v1601_v40 = vpop.f32.mrf.mxu1 }
  0x99   : > { %v316_v43 = vpop.f32.mrf.mxu0  ;;  %1285 = vmatmul.msk.f32.gmra.mxu1 %vm271_vm0, %v1276_v37 }
  0x9a   : > { %1302 = vmatmul.msk.f32.gmra.mxu2 %vm271_vm0, %v1293_v41 }
  0x9b   : > { %1319 = vmatmul.msk.f32.gmra.mxu3 %vm271_vm0, %v1310_v42 }
  0x9c   : > { %1336 = vmatmul.msk.f32.gmra.mxu0 %vm271_vm0, %v1327_v44 }
  0x9d   : > { %v1610_v45 = vpop.f32.mrf.mxu2 }
  0x9e   : > { %v1612_v46 = vpop.f32.mrf.mxu3  ;;  %v378_v47 = vpop.f32.mrf.mxu1 }
  0x9f   : > { %v379_v12 = vadd.f32 %v378_v47, %v313_v36 }
  0xa1   : > { %v620_v48 = vpop.f32.mrf.mxu0 }
  0xa5   : > { %v453_v49 = vpop.f32.mrf.mxu2 }
  0xa6   : > { %v537_v50 = vpop.f32.mrf.mxu3  ;;  %v381_v51 = vpop.f32.mrf.mxu1  ;;  %v477_v14 = vadd.f32 %v453_v49, %v379_v12 }
  0xa7   : > { %v382_v19 = vadd.f32 %v381_v51, %v316_v43 }
  0xa8   : > { %v561_v16 = vadd.f32 %v537_v50, %v477_v14 }
  0xa9   : > { %v623_v52 = vpop.f32.mrf.mxu0 }
  0xaa   : > { %v644_v21 = vadd.f32 %v620_v48, %v561_v16 }
  0xad   : > { %v456_v53 = vpop.f32.mrf.mxu2 }
  0xae   : > { %v540_v54 = vpop.f32.mrf.mxu3  ;;  %v384_v55 = vpop.f32.mrf.mxu1  ;;  %v478_v22 = vadd.f32 %v456_v53, %v382_v19 }
  0xaf   : > { %v385_v29 = vadd.f32 %v384_v55, %v1590_v35 }
  0xb0   : > { %v562_v25 = vadd.f32 %v540_v54, %v478_v22 }
  0xb1   : > { %v626_v56 = vpop.f32.mrf.mxu0 }
  0xb2   : > { %v645_v32 = vadd.f32 %v623_v52, %v562_v25 }
  0xb5   : > { %v459_v57 = vpop.f32.mrf.mxu2 }
  0xb6   : > { %v543_v58 = vpop.f32.mrf.mxu3  ;;  %v387_v59 = vpop.f32.mrf.mxu1  ;;  %v479_v33 = vadd.f32 %v459_v57, %v385_v29 }
  0xb7   : > { %v388_v44 = vadd.f32 %v387_v59, %v1601_v40 }
  0xb8   : > { %v563_v41 = vadd.f32 %v543_v58, %v479_v33 }
  0xb9   : > { %v1614_v60 = vpop.f32.mrf.mxu0 }
  0xba   : > { %v646_v49 = vadd.f32 %v626_v56, %v563_v41 }
  0xbd   : > { %v462_v61 = vpop.f32.mrf.mxu2 }
  0xbe   : > { %v546_v62 = vpop.f32.mrf.mxu3  ;;  %v1616_v63 = vpop.f32.mrf.mxu1  ;;  %v480_v50 = vadd.f32 %v462_v61, %v388_v44 }
  0xbf   : > { %v391_v19 = vadd.f32 %v1616_v63, %v1597_v38 }
  0xc0   : > { %v564_v14 = vadd.f32 %v546_v62, %v480_v50 }
  0xc1   : > { %v1618_v0 = vpop.f32.mrf.mxu0 }
  0xc2   : > { %v647_v22 = vadd.f32 %v1614_v60, %v564_v14 }
  0xc5   : > { %v1620_v1 = vpop.f32.mrf.mxu2 }
  0xc6   : > { %v1622_v2 = vpop.f32.mrf.mxu3  ;;  %v1624_v3 = vpop.f32.mrf.mxu1 }
  0xc9   : > { %v1626_v4 = vpop.f32.mrf.mxu0 }
  0xcd   : > { %v1628_v5 = vpop.f32.mrf.mxu2 }
  0xce   : > { %v1630_v6 = vpop.f32.mrf.mxu3  ;;  %v1632_v7 = vpop.f32.mrf.mxu1 }
  0xd1   : > { %v1634_v8 = vpop.f32.mrf.mxu0 }
  0xd5   : > { %v1636_v9 = vpop.f32.mrf.mxu2 }
  0xd6   : > { %v1638_v10 = vpop.f32.mrf.mxu3  ;;  %v1640_v11 = vpop.f32.mrf.mxu1 }
  0xd9   : > { %v1642_v13 = vpop.f32.mrf.mxu0 }
  0xdd   : > { %v1644_v15 = vpop.f32.mrf.mxu2 }
  0xde   : > { %v1646_v17 = vpop.f32.mrf.mxu3  ;;  %v703_v18 = vpop.f32.mrf.mxu1 }
  0xdf   : > { %v727_v23 = vadd.f32 %v703_v18, %v644_v21 }
  0xe1   : > { %v953_v20 = vpop.f32.mrf.mxu0 }
  0xe5   : > { %v787_v24 = vpop.f32.mrf.mxu2 }
  0xe6   : > { %v811_v26 = vadd.f32 %v787_v24, %v727_v23  ;;  %v870_v27 = vpop.f32.mrf.mxu3  ;;  %v706_v28 = vpop.f32.mrf.mxu1  ;;  %v481_v23 = vadd.f32 %v1620_v1, %v391_v19  ;;  %v394_v1 = vadd.f32 %v1624_v3, %v1610_v45 }
  0xe7   : > { %v728_v36 = vadd.f32 %v706_v28, %v645_v32 }
  0xe8   : > { %v894_v30 = vadd.f32 %v870_v27, %v811_v26  ;;  %v565_v29 = vadd.f32 %v1622_v2, %v481_v23 }
  0xe9   : > { %v956_v31 = vpop.f32.mrf.mxu0 }
  0xea   : > { %v977_v34 = vadd.f32 %v953_v20, %v894_v30 }
  0xec   : > { %985 = vst.msk [vmem:[%s1653_s22] sm:$0xff] %vm271_vm0, %v977_v34  ;;  %v1014_v51 = vmul.f32 %v977_v34, %v977_v34  ;;  %v993_v52 = vsel %vm271_vm0, %v977_v34, 0.0  ;;  %v648_v34 = vadd.f32 %v1618_v0, %v565_v29 }
  0xed   : > { %v790_v37 = vpop.f32.mrf.mxu2 }
  0xee   : > { %v812_v42 = vadd.f32 %v790_v37, %v728_v36  ;;  %v873_v43 = vpop.f32.mrf.mxu3  ;;  %v709_v35 = vpop.f32.mrf.mxu1  ;;  %v1022_v40 = vsel %vm271_vm0, %v1014_v51, 0.0  ;;  %v482_v36 = vadd.f32 %v1628_v5, %v394_v1  ;;  %v397_v5 = vadd.f32 %v1632_v7, %v1599_v39 }
  0xef   : > { %v729_v54 = vadd.f32 %v709_v35, %v646_v49 }
  0xf0   : > { %v895_v47 = vadd.f32 %v873_v43, %v812_v42  ;;  %v566_v44 = vadd.f32 %v1630_v6, %v482_v36  ;;  %v483_v51 = vadd.f32 %v1636_v9, %v397_v5  ;;  %v400_v9 = vadd.f32 %v1640_v11, %v1612_v46 }
  0xf1   : > { %v959_v48 = vpop.f32.mrf.mxu0 }
  0xf2   : > { %v978_v53 = vadd.f32 %v956_v31, %v895_v47  ;;  %v649_v50 = vadd.f32 %v1626_v4, %v566_v44 }
  0xf4   : > { %986 = vst.msk [vmem:[%s1653_s22 + $0x8] sm:$0xff] %vm271_vm0, %v978_v53  ;;  %v994_v55 = vsel %vm271_vm0, %v978_v53, 0.0  ;;  %v1015_v57 = vmul.f32 %v978_v53, %v978_v53 }
  0xf5   : > { %v995_v58 = vadd.f32 %v994_v55, %v993_v52  ;;  %v793_v12 = vpop.f32.mrf.mxu2 }
  0xf6   : > { %v1023_v59 = vsel %vm271_vm0, %v1015_v57, 0.0  ;;  %v813_v56 = vadd.f32 %v793_v12, %v729_v54  ;;  %v876_v61 = vpop.f32.mrf.mxu3  ;;  %v712_v18 = vpop.f32.mrf.mxu1  ;;  %v567_v12 = vadd.f32 %v1638_v10, %v483_v51 }
  0xf7   : > { %v1024_v16 = vadd.f32 %v1023_v59, %v1022_v40  ;;  %v730_v25 = vadd.f32 %v712_v18, %v647_v22 }
  0xf8   : > { %v896_v20 = vadd.f32 %v876_v61, %v813_v56  ;;  %v650_v56 = vadd.f32 %v1634_v8, %v567_v12  ;;  %v484_v61 = vadd.f32 %v1644_v15, %v400_v9 }
  0xf9   : > { %v962_v21 = vpop.f32.mrf.mxu0 }
  0xfa   : > { %v979_v24 = vadd.f32 %v959_v48, %v896_v20  ;;  %v568_v23 = vadd.f32 %v1646_v17, %v484_v61 }
  0xfc   : > { %987 = vst.msk [vmem:[%s1653_s22 + $0x10] sm:$0xff] %vm271_vm0, %v979_v24  ;;  %v996_v62 = vsel %vm271_vm0, %v979_v24, 0.0  ;;  %v1016_v26 = vmul.f32 %v979_v24, %v979_v24 }
  0xfd   : > { %v997_v27 = vadd.f32 %v996_v62, %v995_v58  ;;  %v796_v28 = vpop.f32.mrf.mxu2  ;;  %v651_v62 = vadd.f32 %v1642_v13, %v568_v23 }
  0xfe   : > { %v1025_v38 = vsel %vm271_vm0, %v1016_v26, 0.0  ;;  %v814_v63 = vadd.f32 %v796_v28, %v730_v25  ;;  %v879_v30 = vpop.f32.mrf.mxu3  ;;  %v715_v60 = vpop.f32.mrf.mxu1 }
  0xff   : > { %v1026_v31 = vadd.f32 %v1025_v38, %v1024_v16  ;;  %v731_v41 = vadd.f32 %v715_v60, %v648_v34 }
 0x100   : > { %v897_v32 = vadd.f32 %v879_v30, %v814_v63 }
 0x101   : > { %v965_v33 = vpop.f32.mrf.mxu0 }
 0x102   : > { %v980_v37 = vadd.f32 %v962_v21, %v897_v32 }
 0x104   : > { %988 = vst.msk [vmem:[%s1653_s22 + $0x18] sm:$0xff] %vm271_vm0, %v980_v37  ;;  %v998_v2 = vsel %vm271_vm0, %v980_v37, 0.0  ;;  %v1017_v42 = vmul.f32 %v980_v37, %v980_v37 }
 0x105   : > { %v999_v43 = vadd.f32 %v998_v2, %v997_v27  ;;  %v799_v35 = vpop.f32.mrf.mxu2 }
 0x106   : > { %v1027_v45 = vsel %vm271_vm0, %v1017_v42, 0.0  ;;  %v815_v3 = vadd.f32 %v799_v35, %v731_v41  ;;  %v882_v47 = vpop.f32.mrf.mxu3  ;;  %v718_v0 = vpop.f32.mrf.mxu1 }
 0x107   : > { %v1028_v48 = vadd.f32 %v1027_v45, %v1026_v31  ;;  %v732_v54 = vadd.f32 %v718_v0, %v649_v50 }
 0x108   : > { %v898_v49 = vadd.f32 %v882_v47, %v815_v3 }
 0x109   : > { %v968_v52 = vpop.f32.mrf.mxu0 }
 0x10a   : > { %v981_v53 = vadd.f32 %v965_v33, %v898_v49 }
 0x10c   : > { %989 = vst.msk [vmem:[%s1653_s22 + $0x20] sm:$0xff] %vm271_vm0, %v981_v53  ;;  %v1000_v6 = vsel %vm271_vm0, %v981_v53, 0.0  ;;  %v1018_v55 = vmul.f32 %v981_v53, %v981_v53 }
 0x10d   : > { %v1001_v57 = vadd.f32 %v1000_v6, %v999_v43  ;;  %v802_v58 = vpop.f32.mrf.mxu2 }
 0x10e   : > { %v1029_v39 = vsel %vm271_vm0, %v1018_v55, 0.0  ;;  %v816_v7 = vadd.f32 %v802_v58, %v732_v54  ;;  %v885_v14 = vpop.f32.mrf.mxu3  ;;  %v721_v40 = vpop.f32.mrf.mxu1 }
 0x10f   : > { %v1030_v4 = vadd.f32 %v1029_v39, %v1028_v48  ;;  %v733_v18 = vadd.f32 %v721_v40, %v650_v56 }
 0x110   : > { %v899_v59 = vadd.f32 %v885_v14, %v816_v7 }
 0x111   : > { %v971_v22 = vpop.f32.mrf.mxu0 }
 0x112   : > { %v982_v16 = vadd.f32 %v968_v52, %v899_v59 }
 0x114   : > { %990 = vst.msk [vmem:[%s1653_s22 + $0x28] sm:$0xff] %vm271_vm0, %v982_v16  ;;  %v1002_v10 = vsel %vm271_vm0, %v982_v16, 0.0  ;;  %v1019_v19 = vmul.f32 %v982_v16, %v982_v16 }
 0x115   : > { %v1003_v20 = vadd.f32 %v1002_v10, %v1001_v57  ;;  %v805_v21 = vpop.f32.mrf.mxu2 }
 0x116   : > { %v1031_v46 = vsel %vm271_vm0, %v1019_v19, 0.0  ;;  %v817_v11 = vadd.f32 %v805_v21, %v733_v18  ;;  %v888_v24 = vpop.f32.mrf.mxu3  ;;  %v724_v15 = vpop.f32.mrf.mxu1 }
 0x117   : > { %v1032_v8 = vadd.f32 %v1031_v46, %v1030_v4  ;;  %v734_v27 = vadd.f32 %v724_v15, %v651_v62 }
 0x118   : > { %v900_v25 = vadd.f32 %v888_v24, %v817_v11 }
 0x119   : > { %v974_v1 = vpop.f32.mrf.mxu0 }
 0x11a   : > { %v983_v26 = vadd.f32 %v971_v22, %v900_v25 }
 0x11c   : > { %991 = vst.msk [vmem:[%s1653_s22 + $0x30] sm:$0xff] %vm271_vm0, %v983_v26  ;;  %v1004_v28 = vsel %vm271_vm0, %v983_v26, 0.0  ;;  %v1020_v29 = vmul.f32 %v983_v26, %v983_v26 }
 0x11d   : > { %v1005_v38 = vadd.f32 %v1004_v28, %v1003_v20  ;;  %v808_v63 = vpop.f32.mrf.mxu2 }
 0x11e   : > { %v1033_v17 = vsel %vm271_vm0, %v1020_v29, 0.0  ;;  %v818_v30 = vadd.f32 %v808_v63, %v734_v27  ;;  %v891_v31 = vpop.f32.mrf.mxu3 }
 0x11f   : > { %v1034_v60 = vadd.f32 %v1033_v17, %v1032_v8 }
 0x120   : > { %v901_v32 = vadd.f32 %v891_v31, %v818_v30 }
 0x122   : > { %v984_v33 = vadd.f32 %v974_v1, %v901_v32 }
 0x124   : > { %992 = vst.msk [vmem:[%s1653_s22 + $0x38] sm:$0xff] %vm271_vm0, %v984_v33  ;;  %v1006_v13 = vsel %vm271_vm0, %v984_v33, 0.0  ;;  %v1021_v34 = vmul.f32 %v984_v33, %v984_v33 }
 0x125   : > { %v1007_v36 = vadd.f32 %v1006_v13, %v1005_v38 }
 0x126   : > { %v1035_v37 = vsel %vm271_vm0, %v1021_v34, 0.0 }
 0x127   : > { %v1008_v41 = vrot.slane %v1007_v36, 4  ;;  %v1036_v2 = vadd.f32 %v1035_v37, %v1034_v60 }
 0x129   : > { %v1009_v42 = vadd.f32 %v1008_v41, %v1007_v36  ;;  %v1037_v43 = vrot.slane %v1036_v2, 4 }
 0x12b   : > { %v1010_v35 = vrot.slane %v1009_v42, 2  ;;  %v1038_v44 = vadd.f32 %v1037_v43, %v1036_v2 }
 0x12d   : > { %v1011_v45 = vadd.f32 %v1010_v35, %v1009_v42  ;;  %v1039_v3 = vrot.slane %v1038_v44, 2 }
 0x12f   : > { %v1012_v47 = vrot.slane %v1011_v45, 1  ;;  %v1040_v48 = vadd.f32 %v1039_v3, %v1038_v44 }
 0x131   : > { %v1013_v0 = vadd.f32 %v1012_v47, %v1011_v45  ;;  %v1041_v5 = vrot.slane %v1040_v48, 1 }
 0x133   : > { %v1042_v49 = vadd.f32 %v1041_v5, %v1040_v48  ;;  %1048 = vst.msk [vmem:[%s248_s25] sm:$0x1] %vm1047_vm1, %v1013_v0 }
 0x135   : > { %1049 = vst.msk [vmem:[%s251_s28] sm:$0x1] %vm1047_vm1, %v1042_v49 }
 0x136 PF: > { %s15_s17 = sadd.s32 1, %s1390_s17   ;;  %s1731_s15 = smov %s1386_s16 }
 0x137   : > { %p12_p5 = scmp.ge.s32.totalorder %s15_s17, 4   ;;  %s1732_s16 = smov %s1734_s18 }
 0x139   :  { %14 = sbr.rel (!%p12_p5) target bundleno = 2 (0x2), region = 100 }

</bundles_post_ra>
